<compile_context>
chip_gen: v6e
topology: v6e:2x2x1
jax: 0.10.0
libtpu: 0.0.40
codegen_flags: <defaults>
</compile_context>

<pallas_src>
import jax
import jax.numpy as jnp
from jax.experimental import pallas as pl
from jax.experimental.pallas import tpu as pltpu

# ---------------- small-config hyperparameters (consistent with the module) ---
IMG = 16          # img_size
PATCH = 8         # patch_size
IN_CHANS = 3      # in_chans
EMBED = 32        # embed_dim
DEPTH = 2         # depth
HEADS = 4         # num_heads
MLP_RATIO = 4.0   # mlp_ratio
FRAMES = 4        # num_frames
TUBELET = 2       # tubelet_size

HEAD_DIM = EMBED // HEADS
HIDDEN = int(EMBED * MLP_RATIO)
NUM_TUBELETS = (IMG // PATCH) ** 2 * (FRAMES // TUBELET)   # = 8
SEQ = NUM_TUBELETS + 1                                     # +1 cls token = 9
SEQ_PAD = 16                                               # pad 9 -> 16 (sublane-dense)
PATCH_K = IN_CHANS * TUBELET * PATCH * PATCH               # 384 (lane-dense, 3*128)
HS = HEADS * SEQ_PAD                                       # 64 = packed key axis
EPS = 1e-5
SCALE = HEAD_DIM ** (-0.5)
NEG = -1e30


# ------------------------------ kernel helpers ----------------------------------
def _layernorm(x, w, b):
    mu = jnp.mean(x, axis=-1, keepdims=True)
    var = jnp.mean((x - mu) ** 2, axis=-1, keepdims=True)
    return (x - mu) * jax.lax.rsqrt(var + EPS) * w + b


def _erf_poly(z):
    # Abramowitz & Stegun 7.1.26, |err| < 1.5e-7; only exp / mul / add / where.
    az = jnp.abs(z)
    t = 1.0 / (1.0 + 0.3275911 * az)
    poly = t * (0.254829592 + t * (-0.284496736 + t * (1.421413741
            + t * (-1.453152027 + t * 1.061405429))))
    e = 1.0 - poly * jnp.exp(-az * az)
    return jnp.where(z < 0, -e, e)


def _gelu_exact(x):
    return 0.5 * x * (1.0 + _erf_poly(x * 0.7071067811865476))


# ------------------------------ Pallas kernel ------------------------------------
def fused_vivit_kernel(
    patches_ref, convw_ref, ebias_ref, kbias_ref, seg_ref,
    ln1w_ref, ln1b_ref, wqkv_ref, wproj_ref, bproj_ref,
    ln2w_ref, ln2b_ref, wfc1_ref, bfc1_ref, wfc2_ref, bfc2_ref,
    normw_ref, normb_ref,
    o_ref,
):
    f32 = jnp.float32
    E = EMBED

    # ---- tubelet embedding: one dense matmul + pre-folded (conv_b/cls/pos) bias
    # padded rows (0 and 9..15) of patches are zero host-side; ebias row 0 holds
    # cls_token + pos[0], rows 1..8 hold conv_b + pos[1..8], rows 9..15 are 0.
    x = (jnp.dot(patches_ref[0], convw_ref[...], preferred_element_type=f32)
         + ebias_ref[...])                                     # (SEQ_PAD, E)

    # per-head lane masks over the 32 embedding lanes (hoisted out of the loop)
    lane = jax.lax.broadcasted_iota(jnp.int32, (1, E), 1)
    head_masks = [
        ((lane >= h * HEAD_DIM) & (lane < (h + 1) * HEAD_DIM)).astype(f32)
        for h in range(HEADS)
    ]
    kbias = kbias_ref[...]      # (1, HS): 0 for valid keys, -1e30 for padded keys
    seg = seg_ref[...]          # (HS, HS): block-diagonal ones (per-head sum matrix)

    for d in range(DEPTH):                                    # static unroll (depth=2)
        # ---------------- attention branch (pre-norm) ----------------
        h = _layernorm(x, ln1w_ref[d], ln1b_ref[d])
        qkv = jnp.dot(h, wqkv_ref[d], preferred_element_type=f32)   # (SEQ_PAD, 3E)
        q = qkv[:, :E]              # q columns were pre-scaled by SCALE host-side
        k = qkv[:, E:2 * E]
        v = qkv[:, 2 * E:]

        # pack all heads along the key axis: block h = k/v masked to head-h lanes
        k_m = jnp.concatenate([k * m for m in head_masks], axis=0)  # (HS, E)
        v_m = jnp.concatenate([v * m for m in head_masks], axis=0)  # (HS, E)

        # all-heads scores in one matmul (contract the embedding axis of both)
        s = jax.lax.dot_general(q, k_m, (((1,), (1,)), ((), ())),
                                preferred_element_type=f32) + kbias  # (SEQ_PAD, HS)
        # shared row max is valid: the constant cancels inside each head's segment
        p = jnp.exp(s - jnp.max(s, axis=-1, keepdims=True))
        denom = jnp.dot(p, seg, preferred_element_type=f32)         # per-head sums
        p = p * pl.reciprocal(denom, approx=True)
        attn = jnp.dot(p, v_m, preferred_element_type=f32)          # (SEQ_PAD, E)

        x = x + jnp.dot(attn, wproj_ref[d], preferred_element_type=f32) + bproj_ref[d]

        # ---------------- MLP branch (pre-norm) ----------------
        h = _layernorm(x, ln2w_ref[d], ln2b_ref[d])
        m = jnp.dot(h, wfc1_ref[d], preferred_element_type=f32) + bfc1_ref[d]
        m = _gelu_exact(m)                                           # exact erf GELU
        x = x + jnp.dot(m, wfc2_ref[d], preferred_element_type=f32) + bfc2_ref[d]

    # ---- final LayerNorm; dense full-slab store (wrapper slices off pad rows) ----
    o_ref[0] = _layernorm(x, normw_ref[...], normb_ref[...])


# ------------------------------ host-side helpers --------------------------------
def _patchify(x):
    # x: (B, C, T, H, W) -> (B, NUM_TUBELETS, C*ts*ps*ps); tubelet order = (t, h, w)
    # TODO(synk): the strided Conv3d patch extraction (5-D reshape/transpose) stays
    # as XLA glue; the equivalent matmul is fused into the Pallas kernel.
    B, C, T, H, W = x.shape
    xr = x.reshape(B, C, T // TUBELET, TUBELET, H // PATCH, PATCH, W // PATCH, PATCH)
    xr = xr.transpose(0, 2, 4, 6, 1, 3, 5, 7)
    return xr.reshape(B, NUM_TUBELETS, PATCH_K)


def vivit_forward(x, params):
    B = x.shape[0]
    patches = _patchify(x)
    # row 0 (cls slot) and rows 9..15 (seq pad) are zero -> matmul leaves them 0
    patches_pad = jnp.pad(patches, ((0, 0), (1, SEQ_PAD - SEQ), (0, 0)))

    weight_args = (
        params["conv_w_flat_t"], params["embed_bias"],
        params["key_bias"], params["segsum"],
        params["ln1_w"], params["ln1_b"], params["w_qkv_fused"],
        params["w_proj"], params["b_proj"],
        params["ln2_w"], params["ln2_b"],
        params["w_fc1"], params["b_fc1"], params["w_fc2"], params["b_fc2"],
        params["norm_w"], params["norm_b"],
    )
    # weights: same block (index 0) for every batch step -> stay VMEM resident
    weight_specs = [
        pl.BlockSpec(a.shape, lambda b, nd=a.ndim: (0,) * nd) for a in weight_args
    ]

    out_pad = pl.pallas_call(
        fused_vivit_kernel,
        out_shape=jax.ShapeDtypeStruct((B, SEQ_PAD, EMBED), jnp.float32),
        grid=(B,),
        in_specs=[pl.BlockSpec((1, SEQ_PAD, PATCH_K), lambda b: (b, 0, 0))]
                 + weight_specs,
        out_specs=pl.BlockSpec((1, SEQ_PAD, EMBED), lambda b: (b, 0, 0)),
        compiler_params=pltpu.CompilerParams(dimension_semantics=("parallel",)),
    )(patches_pad, *weight_args)
    return out_pad[:, :SEQ, :]


# ------------------------------ parameter init ----------------------------------
def _xavier_uniform(key, in_dim, out_dim):
    limit = (6.0 / (in_dim + out_dim)) ** 0.5
    return jax.random.uniform(key, (in_dim, out_dim), jnp.float32, -limit, limit)


def init_params(key):
    keys = iter(jax.random.split(key, 3 + 4 * DEPTH))
    params = {}

    # TubeletEmbedding Conv3d (stride == kernel) == patchify + matmul
    bound = 1.0 / (PATCH_K ** 0.5)
    conv_w = jax.random.uniform(
        next(keys), (EMBED, IN_CHANS, TUBELET, PATCH, PATCH), jnp.float32,
        -bound, bound)
    conv_b = jax.random.uniform(next(keys), (EMBED,), jnp.float32, -bound, bound)
    params["conv_w_flat_t"] = conv_w.reshape(EMBED, PATCH_K).T     # (K, E)
    params["conv_b"] = conv_b

    params["cls_token"] = jnp.zeros((1, EMBED), jnp.float32)
    pos = (jax.random.truncated_normal(next(keys), -2.0, 2.0,
                                       (SEQ, EMBED), jnp.float32) * 0.02)
    params["pos_embed"] = pos

    # fold conv_b + cls_token + pos_embed into one additive (SEQ_PAD, E) slab
    embed_bias = jnp.zeros((SEQ_PAD, EMBED), jnp.float32)
    embed_bias = embed_bias.at[0].set(params["cls_token"][0] + pos[0])
    embed_bias = embed_bias.at[1:SEQ].set(conv_b[None, :] + pos[1:])
    params["embed_bias"] = embed_bias

    # packed-heads attention constants
    kk = jnp.arange(HS) % SEQ_PAD
    params["key_bias"] = jnp.where(kk < SEQ, 0.0, NEG).astype(jnp.float32)[None, :]
    seg_id = jnp.arange(HS) // SEQ_PAD
    params["segsum"] = (seg_id[:, None] == seg_id[None, :]).astype(jnp.float32)

    wq, wk, wv, wqkv, wproj, wfc1, wfc2 = [], [], [], [], [], [], []
    for _ in range(DEPTH):
        w = _xavier_uniform(next(keys), EMBED, 3 * EMBED)          # qkv_bias=False
        wq.append(w[:, :EMBED])
        wk.append(w[:, EMBED:2 * EMBED])
        wv.append(w[:, 2 * EMBED:])
        # fused qkv weight with the attention scale folded into the q columns
        wqkv.append(jnp.concatenate([w[:, :EMBED] * SCALE, w[:, EMBED:]], axis=1))
        wproj.append(_xavier_uniform(next(keys), EMBED, EMBED))
        wfc1.append(_xavier_uniform(next(keys), EMBED, HIDDEN))
        wfc2.append(_xavier_uniform(next(keys), HIDDEN, EMBED))

    params["w_q"] = jnp.stack(wq)                                  # reference only
    params["w_k"] = jnp.stack(wk)
    params["w_v"] = jnp.stack(wv)
    params["w_qkv_fused"] = jnp.stack(wqkv)                        # (DEPTH, E, 3E)
    params["w_proj"] = jnp.stack(wproj)
    params["b_proj"] = jnp.zeros((DEPTH, 1, EMBED), jnp.float32)
    params["w_fc1"] = jnp.stack(wfc1)
    params["b_fc1"] = jnp.zeros((DEPTH, 1, HIDDEN), jnp.float32)
    params["w_fc2"] = jnp.stack(wfc2)
    params["b_fc2"] = jnp.zeros((DEPTH, 1, EMBED), jnp.float32)

    params["ln1_w"] = jnp.ones((DEPTH, 1, EMBED), jnp.float32)
    params["ln1_b"] = jnp.zeros((DEPTH, 1, EMBED), jnp.float32)
    params["ln2_w"] = jnp.ones((DEPTH, 1, EMBED), jnp.float32)
    params["ln2_b"] = jnp.zeros((DEPTH, 1, EMBED), jnp.float32)
    params["norm_w"] = jnp.ones((1, EMBED), jnp.float32)
    params["norm_b"] = jnp.zeros((1, EMBED), jnp.float32)
    return params


# ------------------------------ pure-JAX reference -------------------------------
def _ref_forward(x, params):
    P = jax.lax.Precision.HIGHEST
    B = x.shape[0]
    patches = _patchify(x).reshape(B * NUM_TUBELETS, PATCH_K)
    tokens = jnp.dot(patches, params["conv_w_flat_t"], precision=P) + params["conv_b"]
    tokens = tokens.reshape(B, NUM_TUBELETS, EMBED)
    cls = jnp.broadcast_to(params["cls_token"][None], (B, 1, EMBED))
    h = jnp.concatenate([cls, tokens], axis=1) + params["pos_embed"][None]

    def ln(v, w, b):
        mu = jnp.mean(v, -1, keepdims=True)
        var = jnp.mean((v - mu) ** 2, -1, keepdims=True)
        return (v - mu) / jnp.sqrt(var + EPS) * w + b

    for d in range(DEPTH):
        n1 = ln(h, params["ln1_w"][d], params["ln1_b"][d])
        q = jnp.einsum("bnc,cd->bnd", n1, params["w_q"][d], precision=P)
        k = jnp.einsum("bnc,cd->bnd", n1, params["w_k"][d], precision=P)
        v = jnp.einsum("bnc,cd->bnd", n1, params["w_v"][d], precision=P)
        q = q.reshape(B, SEQ, HEADS, HEAD_DIM).transpose(0, 2, 1, 3)
        k = k.reshape(B, SEQ, HEADS, HEAD_DIM).transpose(0, 2, 1, 3)
        v = v.reshape(B, SEQ, HEADS, HEAD_DIM).transpose(0, 2, 1, 3)
        attn = jnp.einsum("bhnd,bhmd->bhnm", q, k, precision=P) * SCALE
        attn = jax.nn.softmax(attn, axis=-1)
        o = jnp.einsum("bhnm,bhmd->bhnd", attn, v, precision=P)
        o = o.transpose(0, 2, 1, 3).reshape(B, SEQ, EMBED)
        o = jnp.einsum("bnc,cd->bnd", o, params["w_proj"][d], precision=P) \
            + params["b_proj"][d]
        h = h + o
        n2 = ln(h, params["ln2_w"][d], params["ln2_b"][d])
        m = jnp.einsum("bnc,ch->bnh", n2, params["w_fc1"][d], precision=P) \
            + params["b_fc1"][d]
        m = jax.nn.gelu(m, approximate=False)
        m = jnp.einsum("bnh,hc->bnc", m, params["w_fc2"][d], precision=P) \
            + params["b_fc2"][d]
        h = h + m
    return ln(h, params["norm_w"], params["norm_b"])


# ------------------------------ main ---------------------------------------------
if __name__ == "__main__":
    key = jax.random.PRNGKey(0)
    kx, kp = jax.random.split(key)
    x = jax.random.normal(kx, (2, IN_CHANS, FRAMES, IMG, IMG), jnp.float32)
    params = init_params(kp)

    out = jax.block_until_ready(vivit_forward(x, params))

    ref = _ref_forward(x, params)
    assert out.shape == (2, SEQ, EMBED), out.shape
    max_err = float(jnp.max(jnp.abs(out - ref)))
    assert max_err < 5e-3, f"max abs error {max_err}"

    print("KERNEL_OK")
</pallas_src>

<mosaic_0001>
module attributes {stable_mosaic.version = 11 : i64} {
  func.func @fused_vivit_kernel(%arg0: i32, %arg1: memref<1x16x384xf32, #tpu.memory_space<vmem>>, %arg2: memref<384x32xf32, #tpu.memory_space<vmem>>, %arg3: memref<16x32xf32, #tpu.memory_space<vmem>>, %arg4: memref<1x64xf32, #tpu.memory_space<vmem>>, %arg5: memref<64x64xf32, #tpu.memory_space<vmem>>, %arg6: memref<2x1x32xf32, #tpu.memory_space<vmem>>, %arg7: memref<2x1x32xf32, #tpu.memory_space<vmem>>, %arg8: memref<2x32x96xf32, #tpu.memory_space<vmem>>, %arg9: memref<2x32x32xf32, #tpu.memory_space<vmem>>, %arg10: memref<2x1x32xf32, #tpu.memory_space<vmem>>, %arg11: memref<2x1x32xf32, #tpu.memory_space<vmem>>, %arg12: memref<2x1x32xf32, #tpu.memory_space<vmem>>, %arg13: memref<2x32x128xf32, #tpu.memory_space<vmem>>, %arg14: memref<2x1x128xf32, #tpu.memory_space<vmem>>, %arg15: memref<2x128x32xf32, #tpu.memory_space<vmem>>, %arg16: memref<2x1x32xf32, #tpu.memory_space<vmem>>, %arg17: memref<1x32xf32, #tpu.memory_space<vmem>>, %arg18: memref<1x32xf32, #tpu.memory_space<vmem>>, %arg19: memref<1x16x32xf32, #tpu.memory_space<vmem>>) attributes {dimension_semantics = [#tpu.dimension_semantics<parallel>], iteration_bounds = array<i64: 2>, scalar_prefetch = 0 : i64, scratch_operands = 0 : i64, tpu.core_type = #tpu.core_type<tc>, window_params = [{transform_indices = @transform_0, window_bounds = array<i64: 1, 16, 384>}, {pipeline_mode = #tpu.pipeline_mode<synchronous>, transform_indices = @transform_1, window_bounds = array<i64: 384, 32>}, {pipeline_mode = #tpu.pipeline_mode<synchronous>, transform_indices = @transform_2, window_bounds = array<i64: 16, 32>}, {pipeline_mode = #tpu.pipeline_mode<synchronous>, transform_indices = @transform_3, window_bounds = array<i64: 1, 64>}, {pipeline_mode = #tpu.pipeline_mode<synchronous>, transform_indices = @transform_4, window_bounds = array<i64: 64, 64>}, {pipeline_mode = #tpu.pipeline_mode<synchronous>, transform_indices = @transform_5, window_bounds = array<i64: 2, 1, 32>}, {pipeline_mode = #tpu.pipeline_mode<synchronous>, transform_indices = @transform_6, window_bounds = array<i64: 2, 1, 32>}, {pipeline_mode = #tpu.pipeline_mode<synchronous>, transform_indices = @transform_7, window_bounds = array<i64: 2, 32, 96>}, {pipeline_mode = #tpu.pipeline_mode<synchronous>, transform_indices = @transform_8, window_bounds = array<i64: 2, 32, 32>}, {pipeline_mode = #tpu.pipeline_mode<synchronous>, transform_indices = @transform_9, window_bounds = array<i64: 2, 1, 32>}, {pipeline_mode = #tpu.pipeline_mode<synchronous>, transform_indices = @transform_10, window_bounds = array<i64: 2, 1, 32>}, {pipeline_mode = #tpu.pipeline_mode<synchronous>, transform_indices = @transform_11, window_bounds = array<i64: 2, 1, 32>}, {pipeline_mode = #tpu.pipeline_mode<synchronous>, transform_indices = @transform_12, window_bounds = array<i64: 2, 32, 128>}, {pipeline_mode = #tpu.pipeline_mode<synchronous>, transform_indices = @transform_13, window_bounds = array<i64: 2, 1, 128>}, {pipeline_mode = #tpu.pipeline_mode<synchronous>, transform_indices = @transform_14, window_bounds = array<i64: 2, 128, 32>}, {pipeline_mode = #tpu.pipeline_mode<synchronous>, transform_indices = @transform_15, window_bounds = array<i64: 2, 1, 32>}, {pipeline_mode = #tpu.pipeline_mode<synchronous>, transform_indices = @transform_16, window_bounds = array<i64: 1, 32>}, {pipeline_mode = #tpu.pipeline_mode<synchronous>, transform_indices = @transform_17, window_bounds = array<i64: 1, 32>}, {transform_indices = @transform_18, window_bounds = array<i64: 1, 16, 32>}]} {
    %c0 = arith.constant 0 : index
    %c0_0 = arith.constant 0 : index
    %c0_1 = arith.constant 0 : index
    %0 = vector.load %arg1[%c0, %c0_0, %c0_1] : memref<1x16x384xf32, #tpu.memory_space<vmem>>, vector<1x16x384xf32>
    %1 = vector.shape_cast %0 : vector<1x16x384xf32> to vector<16x384xf32>
    %c0_2 = arith.constant 0 : index
    %c0_3 = arith.constant 0 : index
    %2 = vector.load %arg2[%c0_2, %c0_3] : memref<384x32xf32, #tpu.memory_space<vmem>>, vector<384x32xf32>
    %cst = arith.constant dense<0.000000e+00> : vector<16x32xf32>
    %3 = tpu.matmul %1, %2, %cst {dimension_numbers = #tpu.dot_dimension_numbers<[1], [0], [0], [1], [0, 0, 1, 1], [], []>} : vector<16x384xf32>, vector<384x32xf32>, vector<16x32xf32> -> vector<16x32xf32>
    %c0_4 = arith.constant 0 : index
    %c0_5 = arith.constant 0 : index
    %4 = vector.load %arg3[%c0_4, %c0_5] : memref<16x32xf32, #tpu.memory_space<vmem>>, vector<16x32xf32>
    %5 = arith.addf %3, %4 : vector<16x32xf32>
    %6 = tpu.iota {dimensions = array<i32: 1>} : vector<1x32xi32>
    %c0_i32 = arith.constant 0 : i32
    %7 = vector.broadcast %c0_i32 : i32 to vector<1x32xi32>
    %8 = arith.cmpi sge, %6, %7 : vector<1x32xi32>
    %c8_i32 = arith.constant 8 : i32
    %9 = vector.broadcast %c8_i32 : i32 to vector<1x32xi32>
    %10 = arith.cmpi slt, %6, %9 : vector<1x32xi32>
    %11 = arith.andi %8, %10 : vector<1x32xi1>
    %12 = arith.extui %11 : vector<1x32xi1> to vector<1x32xi32>
    %13 = arith.sitofp %12 : vector<1x32xi32> to vector<1x32xf32>
    %c8_i32_6 = arith.constant 8 : i32
    %14 = vector.broadcast %c8_i32_6 : i32 to vector<1x32xi32>
    %15 = arith.cmpi sge, %6, %14 : vector<1x32xi32>
    %c16_i32 = arith.constant 16 : i32
    %16 = vector.broadcast %c16_i32 : i32 to vector<1x32xi32>
    %17 = arith.cmpi slt, %6, %16 : vector<1x32xi32>
    %18 = arith.andi %15, %17 : vector<1x32xi1>
    %19 = arith.extui %18 : vector<1x32xi1> to vector<1x32xi32>
    %20 = arith.sitofp %19 : vector<1x32xi32> to vector<1x32xf32>
    %c16_i32_7 = arith.constant 16 : i32
    %21 = vector.broadcast %c16_i32_7 : i32 to vector<1x32xi32>
    %22 = arith.cmpi sge, %6, %21 : vector<1x32xi32>
    %c24_i32 = arith.constant 24 : i32
    %23 = vector.broadcast %c24_i32 : i32 to vector<1x32xi32>
    %24 = arith.cmpi slt, %6, %23 : vector<1x32xi32>
    %25 = arith.andi %22, %24 : vector<1x32xi1>
    %26 = arith.extui %25 : vector<1x32xi1> to vector<1x32xi32>
    %27 = arith.sitofp %26 : vector<1x32xi32> to vector<1x32xf32>
    %c24_i32_8 = arith.constant 24 : i32
    %28 = vector.broadcast %c24_i32_8 : i32 to vector<1x32xi32>
    %29 = arith.cmpi sge, %6, %28 : vector<1x32xi32>
    %c32_i32 = arith.constant 32 : i32
    %30 = vector.broadcast %c32_i32 : i32 to vector<1x32xi32>
    %31 = arith.cmpi slt, %6, %30 : vector<1x32xi32>
    %32 = arith.andi %29, %31 : vector<1x32xi1>
    %33 = arith.extui %32 : vector<1x32xi1> to vector<1x32xi32>
    %34 = arith.sitofp %33 : vector<1x32xi32> to vector<1x32xf32>
    %c0_9 = arith.constant 0 : index
    %c0_10 = arith.constant 0 : index
    %35 = vector.load %arg4[%c0_9, %c0_10] : memref<1x64xf32, #tpu.memory_space<vmem>>, vector<1x64xf32>
    %c0_11 = arith.constant 0 : index
    %c0_12 = arith.constant 0 : index
    %36 = vector.load %arg5[%c0_11, %c0_12] : memref<64x64xf32, #tpu.memory_space<vmem>>, vector<64x64xf32>
    %c0_13 = arith.constant 0 : index
    %c0_14 = arith.constant 0 : index
    %c0_15 = arith.constant 0 : index
    %37 = vector.load %arg6[%c0_13, %c0_14, %c0_15] : memref<2x1x32xf32, #tpu.memory_space<vmem>>, vector<1x1x32xf32>
    %38 = vector.shape_cast %37 : vector<1x1x32xf32> to vector<1x32xf32>
    %c0_16 = arith.constant 0 : index
    %c0_17 = arith.constant 0 : index
    %c0_18 = arith.constant 0 : index
    %39 = vector.load %arg7[%c0_16, %c0_17, %c0_18] : memref<2x1x32xf32, #tpu.memory_space<vmem>>, vector<1x1x32xf32>
    %40 = vector.shape_cast %39 : vector<1x1x32xf32> to vector<1x32xf32>
    %cst_19 = arith.constant dense<0.000000e+00> : vector<16xf32>
    %41 = vector.multi_reduction <add>, %5, %cst_19 [1] : vector<16x32xf32> to vector<16xf32>
    %42 = vector.shape_cast %41 : vector<16xf32> to vector<16x1xf32>
    %cst_20 = arith.constant 3.200000e+01 : f32
    %43 = vector.broadcast %cst_20 : f32 to vector<16x1xf32>
    %44 = arith.divf %42, %43 : vector<16x1xf32>
    %45 = vector.broadcast %44 : vector<16x1xf32> to vector<16x32xf32>
    %46 = arith.subf %5, %45 : vector<16x32xf32>
    %47 = arith.mulf %46, %46 : vector<16x32xf32>
    %cst_21 = arith.constant dense<0.000000e+00> : vector<16xf32>
    %48 = vector.multi_reduction <add>, %47, %cst_21 [1] : vector<16x32xf32> to vector<16xf32>
    %49 = vector.shape_cast %48 : vector<16xf32> to vector<16x1xf32>
    %cst_22 = arith.constant 3.200000e+01 : f32
    %50 = vector.broadcast %cst_22 : f32 to vector<16x1xf32>
    %51 = arith.divf %49, %50 : vector<16x1xf32>
    %52 = vector.broadcast %44 : vector<16x1xf32> to vector<16x32xf32>
    %53 = arith.subf %5, %52 : vector<16x32xf32>
    %cst_23 = arith.constant 9.99999974E-6 : f32
    %54 = vector.broadcast %cst_23 : f32 to vector<16x1xf32>
    %55 = arith.addf %51, %54 : vector<16x1xf32>
    %56 = math.rsqrt %55 : vector<16x1xf32>
    %57 = vector.broadcast %56 : vector<16x1xf32> to vector<16x32xf32>
    %58 = arith.mulf %53, %57 : vector<16x32xf32>
    %59 = vector.broadcast %38 : vector<1x32xf32> to vector<16x32xf32>
    %60 = arith.mulf %58, %59 : vector<16x32xf32>
    %61 = vector.broadcast %40 : vector<1x32xf32> to vector<16x32xf32>
    %62 = arith.addf %60, %61 : vector<16x32xf32>
    %c0_24 = arith.constant 0 : index
    %c0_25 = arith.constant 0 : index
    %c0_26 = arith.constant 0 : index
    %63 = vector.load %arg8[%c0_24, %c0_25, %c0_26] : memref<2x32x96xf32, #tpu.memory_space<vmem>>, vector<1x32x96xf32>
    %64 = vector.shape_cast %63 : vector<1x32x96xf32> to vector<32x96xf32>
    %cst_27 = arith.constant dense<0.000000e+00> : vector<16x96xf32>
    %65 = tpu.matmul %62, %64, %cst_27 {dimension_numbers = #tpu.dot_dimension_numbers<[1], [0], [0], [1], [0, 0, 1, 1], [], []>} : vector<16x32xf32>, vector<32x96xf32>, vector<16x96xf32> -> vector<16x96xf32>
    %66 = vector.extract_strided_slice %65 {offsets = [0, 0], sizes = [16, 32], strides = [1, 1]} : vector<16x96xf32> to vector<16x32xf32>
    %67 = vector.extract_strided_slice %65 {offsets = [0, 32], sizes = [16, 32], strides = [1, 1]} : vector<16x96xf32> to vector<16x32xf32>
    %68 = vector.extract_strided_slice %65 {offsets = [0, 64], sizes = [16, 32], strides = [1, 1]} : vector<16x96xf32> to vector<16x32xf32>
    %69 = vector.broadcast %13 : vector<1x32xf32> to vector<16x32xf32>
    %70 = arith.mulf %67, %69 : vector<16x32xf32>
    %71 = vector.broadcast %20 : vector<1x32xf32> to vector<16x32xf32>
    %72 = arith.mulf %67, %71 : vector<16x32xf32>
    %73 = vector.broadcast %27 : vector<1x32xf32> to vector<16x32xf32>
    %74 = arith.mulf %67, %73 : vector<16x32xf32>
    %75 = vector.broadcast %34 : vector<1x32xf32> to vector<16x32xf32>
    %76 = arith.mulf %67, %75 : vector<16x32xf32>
    %77 = tpu.concatenate %70, %72, %74, %76 in 0 : vector<16x32xf32>, vector<16x32xf32>, vector<16x32xf32>, vector<16x32xf32> -> vector<64x32xf32>
    %78 = vector.broadcast %13 : vector<1x32xf32> to vector<16x32xf32>
    %79 = arith.mulf %68, %78 : vector<16x32xf32>
    %80 = vector.broadcast %20 : vector<1x32xf32> to vector<16x32xf32>
    %81 = arith.mulf %68, %80 : vector<16x32xf32>
    %82 = vector.broadcast %27 : vector<1x32xf32> to vector<16x32xf32>
    %83 = arith.mulf %68, %82 : vector<16x32xf32>
    %84 = vector.broadcast %34 : vector<1x32xf32> to vector<16x32xf32>
    %85 = arith.mulf %68, %84 : vector<16x32xf32>
    %86 = tpu.concatenate %79, %81, %83, %85 in 0 : vector<16x32xf32>, vector<16x32xf32>, vector<16x32xf32>, vector<16x32xf32> -> vector<64x32xf32>
    %cst_28 = arith.constant dense<0.000000e+00> : vector<16x64xf32>
    %87 = tpu.matmul %66, %77, %cst_28 {dimension_numbers = #tpu.dot_dimension_numbers<[1], [1], [0], [0], [0, 0, 1, 0], [], []>} : vector<16x32xf32>, vector<64x32xf32>, vector<16x64xf32> -> vector<16x64xf32>
    %88 = vector.broadcast %35 : vector<1x64xf32> to vector<16x64xf32>
    %89 = arith.addf %87, %88 : vector<16x64xf32>
    %cst_29 = arith.constant dense<0xFF800000> : vector<16xf32>
    %90 = vector.multi_reduction <maximumf>, %89, %cst_29 [1] : vector<16x64xf32> to vector<16xf32>
    %91 = vector.shape_cast %90 : vector<16xf32> to vector<16x1xf32>
    %92 = vector.broadcast %91 : vector<16x1xf32> to vector<16x64xf32>
    %93 = arith.subf %89, %92 : vector<16x64xf32>
    %94 = math.exp %93 : vector<16x64xf32>
    %cst_30 = arith.constant dense<0.000000e+00> : vector<16x64xf32>
    %95 = tpu.matmul %94, %36, %cst_30 {dimension_numbers = #tpu.dot_dimension_numbers<[1], [0], [0], [1], [0, 0, 1, 1], [], []>} : vector<16x64xf32>, vector<64x64xf32>, vector<16x64xf32> -> vector<16x64xf32>
    %96 = tpu.reciprocal %95 {approx = true} : vector<16x64xf32> -> vector<16x64xf32>
    %97 = arith.mulf %94, %96 : vector<16x64xf32>
    %cst_31 = arith.constant dense<0.000000e+00> : vector<16x32xf32>
    %98 = tpu.matmul %97, %86, %cst_31 {dimension_numbers = #tpu.dot_dimension_numbers<[1], [0], [0], [1], [0, 0, 1, 1], [], []>} : vector<16x64xf32>, vector<64x32xf32>, vector<16x32xf32> -> vector<16x32xf32>
    %c0_32 = arith.constant 0 : index
    %c0_33 = arith.constant 0 : index
    %c0_34 = arith.constant 0 : index
    %99 = vector.load %arg9[%c0_32, %c0_33, %c0_34] : memref<2x32x32xf32, #tpu.memory_space<vmem>>, vector<1x32x32xf32>
    %100 = vector.shape_cast %99 : vector<1x32x32xf32> to vector<32x32xf32>
    %cst_35 = arith.constant dense<0.000000e+00> : vector<16x32xf32>
    %101 = tpu.matmul %98, %100, %cst_35 {dimension_numbers = #tpu.dot_dimension_numbers<[1], [0], [0], [1], [0, 0, 1, 1], [], []>} : vector<16x32xf32>, vector<32x32xf32>, vector<16x32xf32> -> vector<16x32xf32>
    %102 = arith.addf %5, %101 : vector<16x32xf32>
    %c0_36 = arith.constant 0 : index
    %c0_37 = arith.constant 0 : index
    %c0_38 = arith.constant 0 : index
    %103 = vector.load %arg10[%c0_36, %c0_37, %c0_38] : memref<2x1x32xf32, #tpu.memory_space<vmem>>, vector<1x1x32xf32>
    %104 = vector.shape_cast %103 : vector<1x1x32xf32> to vector<1x32xf32>
    %105 = vector.broadcast %104 : vector<1x32xf32> to vector<16x32xf32>
    %106 = arith.addf %102, %105 : vector<16x32xf32>
    %c0_39 = arith.constant 0 : index
    %c0_40 = arith.constant 0 : index
    %c0_41 = arith.constant 0 : index
    %107 = vector.load %arg11[%c0_39, %c0_40, %c0_41] : memref<2x1x32xf32, #tpu.memory_space<vmem>>, vector<1x1x32xf32>
    %108 = vector.shape_cast %107 : vector<1x1x32xf32> to vector<1x32xf32>
    %c0_42 = arith.constant 0 : index
    %c0_43 = arith.constant 0 : index
    %c0_44 = arith.constant 0 : index
    %109 = vector.load %arg12[%c0_42, %c0_43, %c0_44] : memref<2x1x32xf32, #tpu.memory_space<vmem>>, vector<1x1x32xf32>
    %110 = vector.shape_cast %109 : vector<1x1x32xf32> to vector<1x32xf32>
    %cst_45 = arith.constant dense<0.000000e+00> : vector<16xf32>
    %111 = vector.multi_reduction <add>, %106, %cst_45 [1] : vector<16x32xf32> to vector<16xf32>
    %112 = vector.shape_cast %111 : vector<16xf32> to vector<16x1xf32>
    %cst_46 = arith.constant 3.200000e+01 : f32
    %113 = vector.broadcast %cst_46 : f32 to vector<16x1xf32>
    %114 = arith.divf %112, %113 : vector<16x1xf32>
    %115 = vector.broadcast %114 : vector<16x1xf32> to vector<16x32xf32>
    %116 = arith.subf %106, %115 : vector<16x32xf32>
    %117 = arith.mulf %116, %116 : vector<16x32xf32>
    %cst_47 = arith.constant dense<0.000000e+00> : vector<16xf32>
    %118 = vector.multi_reduction <add>, %117, %cst_47 [1] : vector<16x32xf32> to vector<16xf32>
    %119 = vector.shape_cast %118 : vector<16xf32> to vector<16x1xf32>
    %cst_48 = arith.constant 3.200000e+01 : f32
    %120 = vector.broadcast %cst_48 : f32 to vector<16x1xf32>
    %121 = arith.divf %119, %120 : vector<16x1xf32>
    %122 = vector.broadcast %114 : vector<16x1xf32> to vector<16x32xf32>
    %123 = arith.subf %106, %122 : vector<16x32xf32>
    %cst_49 = arith.constant 9.99999974E-6 : f32
    %124 = vector.broadcast %cst_49 : f32 to vector<16x1xf32>
    %125 = arith.addf %121, %124 : vector<16x1xf32>
    %126 = math.rsqrt %125 : vector<16x1xf32>
    %127 = vector.broadcast %126 : vector<16x1xf32> to vector<16x32xf32>
    %128 = arith.mulf %123, %127 : vector<16x32xf32>
    %129 = vector.broadcast %108 : vector<1x32xf32> to vector<16x32xf32>
    %130 = arith.mulf %128, %129 : vector<16x32xf32>
    %131 = vector.broadcast %110 : vector<1x32xf32> to vector<16x32xf32>
    %132 = arith.addf %130, %131 : vector<16x32xf32>
    %c0_50 = arith.constant 0 : index
    %c0_51 = arith.constant 0 : index
    %c0_52 = arith.constant 0 : index
    %133 = vector.load %arg13[%c0_50, %c0_51, %c0_52] : memref<2x32x128xf32, #tpu.memory_space<vmem>>, vector<1x32x128xf32>
    %134 = vector.shape_cast %133 : vector<1x32x128xf32> to vector<32x128xf32>
    %cst_53 = arith.constant dense<0.000000e+00> : vector<16x128xf32>
    %135 = tpu.matmul %132, %134, %cst_53 {dimension_numbers = #tpu.dot_dimension_numbers<[1], [0], [0], [1], [0, 0, 1, 1], [], []>} : vector<16x32xf32>, vector<32x128xf32>, vector<16x128xf32> -> vector<16x128xf32>
    %c0_54 = arith.constant 0 : index
    %c0_55 = arith.constant 0 : index
    %c0_56 = arith.constant 0 : index
    %136 = vector.load %arg14[%c0_54, %c0_55, %c0_56] : memref<2x1x128xf32, #tpu.memory_space<vmem>>, vector<1x1x128xf32>
    %137 = vector.shape_cast %136 : vector<1x1x128xf32> to vector<1x128xf32>
    %138 = vector.broadcast %137 : vector<1x128xf32> to vector<16x128xf32>
    %139 = arith.addf %135, %138 : vector<16x128xf32>
    %cst_57 = arith.constant 5.000000e-01 : f32
    %140 = vector.broadcast %cst_57 : f32 to vector<16x128xf32>
    %141 = arith.mulf %140, %139 : vector<16x128xf32>
    %cst_58 = arith.constant 0.707106769 : f32
    %142 = vector.broadcast %cst_58 : f32 to vector<16x128xf32>
    %143 = arith.mulf %139, %142 : vector<16x128xf32>
    %144 = math.absf %143 : vector<16x128xf32>
    %cst_59 = arith.constant 0.327591091 : f32
    %145 = vector.broadcast %cst_59 : f32 to vector<16x128xf32>
    %146 = arith.mulf %145, %144 : vector<16x128xf32>
    %cst_60 = arith.constant 1.000000e+00 : f32
    %147 = vector.broadcast %cst_60 : f32 to vector<16x128xf32>
    %148 = arith.addf %147, %146 : vector<16x128xf32>
    %cst_61 = arith.constant 1.000000e+00 : f32
    %149 = vector.broadcast %cst_61 : f32 to vector<16x128xf32>
    %150 = arith.divf %149, %148 : vector<16x128xf32>
    %cst_62 = arith.constant 1.06140542 : f32
    %151 = vector.broadcast %cst_62 : f32 to vector<16x128xf32>
    %152 = arith.mulf %150, %151 : vector<16x128xf32>
    %cst_63 = arith.constant -1.45315206 : f32
    %153 = vector.broadcast %cst_63 : f32 to vector<16x128xf32>
    %154 = arith.addf %153, %152 : vector<16x128xf32>
    %155 = arith.mulf %150, %154 : vector<16x128xf32>
    %cst_64 = arith.constant 1.42141378 : f32
    %156 = vector.broadcast %cst_64 : f32 to vector<16x128xf32>
    %157 = arith.addf %156, %155 : vector<16x128xf32>
    %158 = arith.mulf %150, %157 : vector<16x128xf32>
    %cst_65 = arith.constant -0.284496725 : f32
    %159 = vector.broadcast %cst_65 : f32 to vector<16x128xf32>
    %160 = arith.addf %159, %158 : vector<16x128xf32>
    %161 = arith.mulf %150, %160 : vector<16x128xf32>
    %cst_66 = arith.constant 0.254829586 : f32
    %162 = vector.broadcast %cst_66 : f32 to vector<16x128xf32>
    %163 = arith.addf %162, %161 : vector<16x128xf32>
    %164 = arith.mulf %150, %163 : vector<16x128xf32>
    %cst_67 = arith.constant 0.000000e+00 : f32
    %165 = vector.broadcast %cst_67 : f32 to vector<16x128xf32>
    %166 = arith.subf %165, %144 : vector<16x128xf32>
    %167 = arith.mulf %166, %144 : vector<16x128xf32>
    %168 = math.exp %167 : vector<16x128xf32>
    %169 = arith.mulf %164, %168 : vector<16x128xf32>
    %cst_68 = arith.constant 1.000000e+00 : f32
    %170 = vector.broadcast %cst_68 : f32 to vector<16x128xf32>
    %171 = arith.subf %170, %169 : vector<16x128xf32>
    %cst_69 = arith.constant 0.000000e+00 : f32
    %172 = vector.broadcast %cst_69 : f32 to vector<16x128xf32>
    %173 = arith.cmpf olt, %143, %172 : vector<16x128xf32>
    %cst_70 = arith.constant 0.000000e+00 : f32
    %174 = vector.broadcast %cst_70 : f32 to vector<16x128xf32>
    %175 = arith.subf %174, %171 : vector<16x128xf32>
    %176 = arith.select %173, %175, %171 : vector<16x128xi1>, vector<16x128xf32>
    %cst_71 = arith.constant 1.000000e+00 : f32
    %177 = vector.broadcast %cst_71 : f32 to vector<16x128xf32>
    %178 = arith.addf %177, %176 : vector<16x128xf32>
    %179 = arith.mulf %141, %178 : vector<16x128xf32>
    %c0_72 = arith.constant 0 : index
    %c0_73 = arith.constant 0 : index
    %c0_74 = arith.constant 0 : index
    %180 = vector.load %arg15[%c0_72, %c0_73, %c0_74] : memref<2x128x32xf32, #tpu.memory_space<vmem>>, vector<1x128x32xf32>
    %181 = vector.shape_cast %180 : vector<1x128x32xf32> to vector<128x32xf32>
    %cst_75 = arith.constant dense<0.000000e+00> : vector<16x32xf32>
    %182 = tpu.matmul %179, %181, %cst_75 {dimension_numbers = #tpu.dot_dimension_numbers<[1], [0], [0], [1], [0, 0, 1, 1], [], []>} : vector<16x128xf32>, vector<128x32xf32>, vector<16x32xf32> -> vector<16x32xf32>
    %183 = arith.addf %106, %182 : vector<16x32xf32>
    %c0_76 = arith.constant 0 : index
    %c0_77 = arith.constant 0 : index
    %c0_78 = arith.constant 0 : index
    %184 = vector.load %arg16[%c0_76, %c0_77, %c0_78] : memref<2x1x32xf32, #tpu.memory_space<vmem>>, vector<1x1x32xf32>
    %185 = vector.shape_cast %184 : vector<1x1x32xf32> to vector<1x32xf32>
    %186 = vector.broadcast %185 : vector<1x32xf32> to vector<16x32xf32>
    %187 = arith.addf %183, %186 : vector<16x32xf32>
    %c1 = arith.constant 1 : index
    %c0_79 = arith.constant 0 : index
    %c0_80 = arith.constant 0 : index
    %188 = vector.load %arg6[%c1, %c0_79, %c0_80] : memref<2x1x32xf32, #tpu.memory_space<vmem>>, vector<1x1x32xf32>
    %189 = vector.shape_cast %188 : vector<1x1x32xf32> to vector<1x32xf32>
    %c1_81 = arith.constant 1 : index
    %c0_82 = arith.constant 0 : index
    %c0_83 = arith.constant 0 : index
    %190 = vector.load %arg7[%c1_81, %c0_82, %c0_83] : memref<2x1x32xf32, #tpu.memory_space<vmem>>, vector<1x1x32xf32>
    %191 = vector.shape_cast %190 : vector<1x1x32xf32> to vector<1x32xf32>
    %cst_84 = arith.constant dense<0.000000e+00> : vector<16xf32>
    %192 = vector.multi_reduction <add>, %187, %cst_84 [1] : vector<16x32xf32> to vector<16xf32>
    %193 = vector.shape_cast %192 : vector<16xf32> to vector<16x1xf32>
    %cst_85 = arith.constant 3.200000e+01 : f32
    %194 = vector.broadcast %cst_85 : f32 to vector<16x1xf32>
    %195 = arith.divf %193, %194 : vector<16x1xf32>
    %196 = vector.broadcast %195 : vector<16x1xf32> to vector<16x32xf32>
    %197 = arith.subf %187, %196 : vector<16x32xf32>
    %198 = arith.mulf %197, %197 : vector<16x32xf32>
    %cst_86 = arith.constant dense<0.000000e+00> : vector<16xf32>
    %199 = vector.multi_reduction <add>, %198, %cst_86 [1] : vector<16x32xf32> to vector<16xf32>
    %200 = vector.shape_cast %199 : vector<16xf32> to vector<16x1xf32>
    %cst_87 = arith.constant 3.200000e+01 : f32
    %201 = vector.broadcast %cst_87 : f32 to vector<16x1xf32>
    %202 = arith.divf %200, %201 : vector<16x1xf32>
    %203 = vector.broadcast %195 : vector<16x1xf32> to vector<16x32xf32>
    %204 = arith.subf %187, %203 : vector<16x32xf32>
    %cst_88 = arith.constant 9.99999974E-6 : f32
    %205 = vector.broadcast %cst_88 : f32 to vector<16x1xf32>
    %206 = arith.addf %202, %205 : vector<16x1xf32>
    %207 = math.rsqrt %206 : vector<16x1xf32>
    %208 = vector.broadcast %207 : vector<16x1xf32> to vector<16x32xf32>
    %209 = arith.mulf %204, %208 : vector<16x32xf32>
    %210 = vector.broadcast %189 : vector<1x32xf32> to vector<16x32xf32>
    %211 = arith.mulf %209, %210 : vector<16x32xf32>
    %212 = vector.broadcast %191 : vector<1x32xf32> to vector<16x32xf32>
    %213 = arith.addf %211, %212 : vector<16x32xf32>
    %c1_89 = arith.constant 1 : index
    %c0_90 = arith.constant 0 : index
    %c0_91 = arith.constant 0 : index
    %214 = vector.load %arg8[%c1_89, %c0_90, %c0_91] : memref<2x32x96xf32, #tpu.memory_space<vmem>>, vector<1x32x96xf32>
    %215 = vector.shape_cast %214 : vector<1x32x96xf32> to vector<32x96xf32>
    %cst_92 = arith.constant dense<0.000000e+00> : vector<16x96xf32>
    %216 = tpu.matmul %213, %215, %cst_92 {dimension_numbers = #tpu.dot_dimension_numbers<[1], [0], [0], [1], [0, 0, 1, 1], [], []>} : vector<16x32xf32>, vector<32x96xf32>, vector<16x96xf32> -> vector<16x96xf32>
    %217 = vector.extract_strided_slice %216 {offsets = [0, 0], sizes = [16, 32], strides = [1, 1]} : vector<16x96xf32> to vector<16x32xf32>
    %218 = vector.extract_strided_slice %216 {offsets = [0, 32], sizes = [16, 32], strides = [1, 1]} : vector<16x96xf32> to vector<16x32xf32>
    %219 = vector.extract_strided_slice %216 {offsets = [0, 64], sizes = [16, 32], strides = [1, 1]} : vector<16x96xf32> to vector<16x32xf32>
    %220 = vector.broadcast %13 : vector<1x32xf32> to vector<16x32xf32>
    %221 = arith.mulf %218, %220 : vector<16x32xf32>
    %222 = vector.broadcast %20 : vector<1x32xf32> to vector<16x32xf32>
    %223 = arith.mulf %218, %222 : vector<16x32xf32>
    %224 = vector.broadcast %27 : vector<1x32xf32> to vector<16x32xf32>
    %225 = arith.mulf %218, %224 : vector<16x32xf32>
    %226 = vector.broadcast %34 : vector<1x32xf32> to vector<16x32xf32>
    %227 = arith.mulf %218, %226 : vector<16x32xf32>
    %228 = tpu.concatenate %221, %223, %225, %227 in 0 : vector<16x32xf32>, vector<16x32xf32>, vector<16x32xf32>, vector<16x32xf32> -> vector<64x32xf32>
    %229 = vector.broadcast %13 : vector<1x32xf32> to vector<16x32xf32>
    %230 = arith.mulf %219, %229 : vector<16x32xf32>
    %231 = vector.broadcast %20 : vector<1x32xf32> to vector<16x32xf32>
    %232 = arith.mulf %219, %231 : vector<16x32xf32>
    %233 = vector.broadcast %27 : vector<1x32xf32> to vector<16x32xf32>
    %234 = arith.mulf %219, %233 : vector<16x32xf32>
    %235 = vector.broadcast %34 : vector<1x32xf32> to vector<16x32xf32>
    %236 = arith.mulf %219, %235 : vector<16x32xf32>
    %237 = tpu.concatenate %230, %232, %234, %236 in 0 : vector<16x32xf32>, vector<16x32xf32>, vector<16x32xf32>, vector<16x32xf32> -> vector<64x32xf32>
    %cst_93 = arith.constant dense<0.000000e+00> : vector<16x64xf32>
    %238 = tpu.matmul %217, %228, %cst_93 {dimension_numbers = #tpu.dot_dimension_numbers<[1], [1], [0], [0], [0, 0, 1, 0], [], []>} : vector<16x32xf32>, vector<64x32xf32>, vector<16x64xf32> -> vector<16x64xf32>
    %239 = vector.broadcast %35 : vector<1x64xf32> to vector<16x64xf32>
    %240 = arith.addf %238, %239 : vector<16x64xf32>
    %cst_94 = arith.constant dense<0xFF800000> : vector<16xf32>
    %241 = vector.multi_reduction <maximumf>, %240, %cst_94 [1] : vector<16x64xf32> to vector<16xf32>
    %242 = vector.shape_cast %241 : vector<16xf32> to vector<16x1xf32>
    %243 = vector.broadcast %242 : vector<16x1xf32> to vector<16x64xf32>
    %244 = arith.subf %240, %243 : vector<16x64xf32>
    %245 = math.exp %244 : vector<16x64xf32>
    %cst_95 = arith.constant dense<0.000000e+00> : vector<16x64xf32>
    %246 = tpu.matmul %245, %36, %cst_95 {dimension_numbers = #tpu.dot_dimension_numbers<[1], [0], [0], [1], [0, 0, 1, 1], [], []>} : vector<16x64xf32>, vector<64x64xf32>, vector<16x64xf32> -> vector<16x64xf32>
    %247 = tpu.reciprocal %246 {approx = true} : vector<16x64xf32> -> vector<16x64xf32>
    %248 = arith.mulf %245, %247 : vector<16x64xf32>
    %cst_96 = arith.constant dense<0.000000e+00> : vector<16x32xf32>
    %249 = tpu.matmul %248, %237, %cst_96 {dimension_numbers = #tpu.dot_dimension_numbers<[1], [0], [0], [1], [0, 0, 1, 1], [], []>} : vector<16x64xf32>, vector<64x32xf32>, vector<16x32xf32> -> vector<16x32xf32>
    %c1_97 = arith.constant 1 : index
    %c0_98 = arith.constant 0 : index
    %c0_99 = arith.constant 0 : index
    %250 = vector.load %arg9[%c1_97, %c0_98, %c0_99] : memref<2x32x32xf32, #tpu.memory_space<vmem>>, vector<1x32x32xf32>
    %251 = vector.shape_cast %250 : vector<1x32x32xf32> to vector<32x32xf32>
    %cst_100 = arith.constant dense<0.000000e+00> : vector<16x32xf32>
    %252 = tpu.matmul %249, %251, %cst_100 {dimension_numbers = #tpu.dot_dimension_numbers<[1], [0], [0], [1], [0, 0, 1, 1], [], []>} : vector<16x32xf32>, vector<32x32xf32>, vector<16x32xf32> -> vector<16x32xf32>
    %253 = arith.addf %187, %252 : vector<16x32xf32>
    %c1_101 = arith.constant 1 : index
    %c0_102 = arith.constant 0 : index
    %c0_103 = arith.constant 0 : index
    %254 = vector.load %arg10[%c1_101, %c0_102, %c0_103] : memref<2x1x32xf32, #tpu.memory_space<vmem>>, vector<1x1x32xf32>
    %255 = vector.shape_cast %254 : vector<1x1x32xf32> to vector<1x32xf32>
    %256 = vector.broadcast %255 : vector<1x32xf32> to vector<16x32xf32>
    %257 = arith.addf %253, %256 : vector<16x32xf32>
    %c1_104 = arith.constant 1 : index
    %c0_105 = arith.constant 0 : index
    %c0_106 = arith.constant 0 : index
    %258 = vector.load %arg11[%c1_104, %c0_105, %c0_106] : memref<2x1x32xf32, #tpu.memory_space<vmem>>, vector<1x1x32xf32>
    %259 = vector.shape_cast %258 : vector<1x1x32xf32> to vector<1x32xf32>
    %c1_107 = arith.constant 1 : index
    %c0_108 = arith.constant 0 : index
    %c0_109 = arith.constant 0 : index
    %260 = vector.load %arg12[%c1_107, %c0_108, %c0_109] : memref<2x1x32xf32, #tpu.memory_space<vmem>>, vector<1x1x32xf32>
    %261 = vector.shape_cast %260 : vector<1x1x32xf32> to vector<1x32xf32>
    %cst_110 = arith.constant dense<0.000000e+00> : vector<16xf32>
    %262 = vector.multi_reduction <add>, %257, %cst_110 [1] : vector<16x32xf32> to vector<16xf32>
    %263 = vector.shape_cast %262 : vector<16xf32> to vector<16x1xf32>
    %cst_111 = arith.constant 3.200000e+01 : f32
    %264 = vector.broadcast %cst_111 : f32 to vector<16x1xf32>
    %265 = arith.divf %263, %264 : vector<16x1xf32>
    %266 = vector.broadcast %265 : vector<16x1xf32> to vector<16x32xf32>
    %267 = arith.subf %257, %266 : vector<16x32xf32>
    %268 = arith.mulf %267, %267 : vector<16x32xf32>
    %cst_112 = arith.constant dense<0.000000e+00> : vector<16xf32>
    %269 = vector.multi_reduction <add>, %268, %cst_112 [1] : vector<16x32xf32> to vector<16xf32>
    %270 = vector.shape_cast %269 : vector<16xf32> to vector<16x1xf32>
    %cst_113 = arith.constant 3.200000e+01 : f32
    %271 = vector.broadcast %cst_113 : f32 to vector<16x1xf32>
    %272 = arith.divf %270, %271 : vector<16x1xf32>
    %273 = vector.broadcast %265 : vector<16x1xf32> to vector<16x32xf32>
    %274 = arith.subf %257, %273 : vector<16x32xf32>
    %cst_114 = arith.constant 9.99999974E-6 : f32
    %275 = vector.broadcast %cst_114 : f32 to vector<16x1xf32>
    %276 = arith.addf %272, %275 : vector<16x1xf32>
    %277 = math.rsqrt %276 : vector<16x1xf32>
    %278 = vector.broadcast %277 : vector<16x1xf32> to vector<16x32xf32>
    %279 = arith.mulf %274, %278 : vector<16x32xf32>
    %280 = vector.broadcast %259 : vector<1x32xf32> to vector<16x32xf32>
    %281 = arith.mulf %279, %280 : vector<16x32xf32>
    %282 = vector.broadcast %261 : vector<1x32xf32> to vector<16x32xf32>
    %283 = arith.addf %281, %282 : vector<16x32xf32>
    %c1_115 = arith.constant 1 : index
    %c0_116 = arith.constant 0 : index
    %c0_117 = arith.constant 0 : index
    %284 = vector.load %arg13[%c1_115, %c0_116, %c0_117] : memref<2x32x128xf32, #tpu.memory_space<vmem>>, vector<1x32x128xf32>
    %285 = vector.shape_cast %284 : vector<1x32x128xf32> to vector<32x128xf32>
    %cst_118 = arith.constant dense<0.000000e+00> : vector<16x128xf32>
    %286 = tpu.matmul %283, %285, %cst_118 {dimension_numbers = #tpu.dot_dimension_numbers<[1], [0], [0], [1], [0, 0, 1, 1], [], []>} : vector<16x32xf32>, vector<32x128xf32>, vector<16x128xf32> -> vector<16x128xf32>
    %c1_119 = arith.constant 1 : index
    %c0_120 = arith.constant 0 : index
    %c0_121 = arith.constant 0 : index
    %287 = vector.load %arg14[%c1_119, %c0_120, %c0_121] : memref<2x1x128xf32, #tpu.memory_space<vmem>>, vector<1x1x128xf32>
    %288 = vector.shape_cast %287 : vector<1x1x128xf32> to vector<1x128xf32>
    %289 = vector.broadcast %288 : vector<1x128xf32> to vector<16x128xf32>
    %290 = arith.addf %286, %289 : vector<16x128xf32>
    %cst_122 = arith.constant 5.000000e-01 : f32
    %291 = vector.broadcast %cst_122 : f32 to vector<16x128xf32>
    %292 = arith.mulf %291, %290 : vector<16x128xf32>
    %cst_123 = arith.constant 0.707106769 : f32
    %293 = vector.broadcast %cst_123 : f32 to vector<16x128xf32>
    %294 = arith.mulf %290, %293 : vector<16x128xf32>
    %295 = math.absf %294 : vector<16x128xf32>
    %cst_124 = arith.constant 0.327591091 : f32
    %296 = vector.broadcast %cst_124 : f32 to vector<16x128xf32>
    %297 = arith.mulf %296, %295 : vector<16x128xf32>
    %cst_125 = arith.constant 1.000000e+00 : f32
    %298 = vector.broadcast %cst_125 : f32 to vector<16x128xf32>
    %299 = arith.addf %298, %297 : vector<16x128xf32>
    %cst_126 = arith.constant 1.000000e+00 : f32
    %300 = vector.broadcast %cst_126 : f32 to vector<16x128xf32>
    %301 = arith.divf %300, %299 : vector<16x128xf32>
    %cst_127 = arith.constant 1.06140542 : f32
    %302 = vector.broadcast %cst_127 : f32 to vector<16x128xf32>
    %303 = arith.mulf %301, %302 : vector<16x128xf32>
    %cst_128 = arith.constant -1.45315206 : f32
    %304 = vector.broadcast %cst_128 : f32 to vector<16x128xf32>
    %305 = arith.addf %304, %303 : vector<16x128xf32>
    %306 = arith.mulf %301, %305 : vector<16x128xf32>
    %cst_129 = arith.constant 1.42141378 : f32
    %307 = vector.broadcast %cst_129 : f32 to vector<16x128xf32>
    %308 = arith.addf %307, %306 : vector<16x128xf32>
    %309 = arith.mulf %301, %308 : vector<16x128xf32>
    %cst_130 = arith.constant -0.284496725 : f32
    %310 = vector.broadcast %cst_130 : f32 to vector<16x128xf32>
    %311 = arith.addf %310, %309 : vector<16x128xf32>
    %312 = arith.mulf %301, %311 : vector<16x128xf32>
    %cst_131 = arith.constant 0.254829586 : f32
    %313 = vector.broadcast %cst_131 : f32 to vector<16x128xf32>
    %314 = arith.addf %313, %312 : vector<16x128xf32>
    %315 = arith.mulf %301, %314 : vector<16x128xf32>
    %cst_132 = arith.constant 0.000000e+00 : f32
    %316 = vector.broadcast %cst_132 : f32 to vector<16x128xf32>
    %317 = arith.subf %316, %295 : vector<16x128xf32>
    %318 = arith.mulf %317, %295 : vector<16x128xf32>
    %319 = math.exp %318 : vector<16x128xf32>
    %320 = arith.mulf %315, %319 : vector<16x128xf32>
    %cst_133 = arith.constant 1.000000e+00 : f32
    %321 = vector.broadcast %cst_133 : f32 to vector<16x128xf32>
    %322 = arith.subf %321, %320 : vector<16x128xf32>
    %cst_134 = arith.constant 0.000000e+00 : f32
    %323 = vector.broadcast %cst_134 : f32 to vector<16x128xf32>
    %324 = arith.cmpf olt, %294, %323 : vector<16x128xf32>
    %cst_135 = arith.constant 0.000000e+00 : f32
    %325 = vector.broadcast %cst_135 : f32 to vector<16x128xf32>
    %326 = arith.subf %325, %322 : vector<16x128xf32>
    %327 = arith.select %324, %326, %322 : vector<16x128xi1>, vector<16x128xf32>
    %cst_136 = arith.constant 1.000000e+00 : f32
    %328 = vector.broadcast %cst_136 : f32 to vector<16x128xf32>
    %329 = arith.addf %328, %327 : vector<16x128xf32>
    %330 = arith.mulf %292, %329 : vector<16x128xf32>
    %c1_137 = arith.constant 1 : index
    %c0_138 = arith.constant 0 : index
    %c0_139 = arith.constant 0 : index
    %331 = vector.load %arg15[%c1_137, %c0_138, %c0_139] : memref<2x128x32xf32, #tpu.memory_space<vmem>>, vector<1x128x32xf32>
    %332 = vector.shape_cast %331 : vector<1x128x32xf32> to vector<128x32xf32>
    %cst_140 = arith.constant dense<0.000000e+00> : vector<16x32xf32>
    %333 = tpu.matmul %330, %332, %cst_140 {dimension_numbers = #tpu.dot_dimension_numbers<[1], [0], [0], [1], [0, 0, 1, 1], [], []>} : vector<16x128xf32>, vector<128x32xf32>, vector<16x32xf32> -> vector<16x32xf32>
    %334 = arith.addf %257, %333 : vector<16x32xf32>
    %c1_141 = arith.constant 1 : index
    %c0_142 = arith.constant 0 : index
    %c0_143 = arith.constant 0 : index
    %335 = vector.load %arg16[%c1_141, %c0_142, %c0_143] : memref<2x1x32xf32, #tpu.memory_space<vmem>>, vector<1x1x32xf32>
    %336 = vector.shape_cast %335 : vector<1x1x32xf32> to vector<1x32xf32>
    %337 = vector.broadcast %336 : vector<1x32xf32> to vector<16x32xf32>
    %338 = arith.addf %334, %337 : vector<16x32xf32>
    %c0_144 = arith.constant 0 : index
    %c0_145 = arith.constant 0 : index
    %339 = vector.load %arg17[%c0_144, %c0_145] : memref<1x32xf32, #tpu.memory_space<vmem>>, vector<1x32xf32>
    %c0_146 = arith.constant 0 : index
    %c0_147 = arith.constant 0 : index
    %340 = vector.load %arg18[%c0_146, %c0_147] : memref<1x32xf32, #tpu.memory_space<vmem>>, vector<1x32xf32>
    %cst_148 = arith.constant dense<0.000000e+00> : vector<16xf32>
    %341 = vector.multi_reduction <add>, %338, %cst_148 [1] : vector<16x32xf32> to vector<16xf32>
    %342 = vector.shape_cast %341 : vector<16xf32> to vector<16x1xf32>
    %cst_149 = arith.constant 3.200000e+01 : f32
    %343 = vector.broadcast %cst_149 : f32 to vector<16x1xf32>
    %344 = arith.divf %342, %343 : vector<16x1xf32>
    %345 = vector.broadcast %344 : vector<16x1xf32> to vector<16x32xf32>
    %346 = arith.subf %338, %345 : vector<16x32xf32>
    %347 = arith.mulf %346, %346 : vector<16x32xf32>
    %cst_150 = arith.constant dense<0.000000e+00> : vector<16xf32>
    %348 = vector.multi_reduction <add>, %347, %cst_150 [1] : vector<16x32xf32> to vector<16xf32>
    %349 = vector.shape_cast %348 : vector<16xf32> to vector<16x1xf32>
    %cst_151 = arith.constant 3.200000e+01 : f32
    %350 = vector.broadcast %cst_151 : f32 to vector<16x1xf32>
    %351 = arith.divf %349, %350 : vector<16x1xf32>
    %352 = vector.broadcast %344 : vector<16x1xf32> to vector<16x32xf32>
    %353 = arith.subf %338, %352 : vector<16x32xf32>
    %cst_152 = arith.constant 9.99999974E-6 : f32
    %354 = vector.broadcast %cst_152 : f32 to vector<16x1xf32>
    %355 = arith.addf %351, %354 : vector<16x1xf32>
    %356 = math.rsqrt %355 : vector<16x1xf32>
    %357 = vector.broadcast %356 : vector<16x1xf32> to vector<16x32xf32>
    %358 = arith.mulf %353, %357 : vector<16x32xf32>
    %359 = vector.broadcast %339 : vector<1x32xf32> to vector<16x32xf32>
    %360 = arith.mulf %358, %359 : vector<16x32xf32>
    %361 = vector.broadcast %340 : vector<1x32xf32> to vector<16x32xf32>
    %362 = arith.addf %360, %361 : vector<16x32xf32>
    %c0_153 = arith.constant 0 : index
    %c0_154 = arith.constant 0 : index
    %c0_155 = arith.constant 0 : index
    %363 = vector.load %arg19[%c0_153, %c0_154, %c0_155] : memref<1x16x32xf32, #tpu.memory_space<vmem>>, vector<1x16x32xf32>
    %364 = vector.shape_cast %363 : vector<1x16x32xf32> to vector<16x32xf32>
    %365 = vector.shape_cast %362 : vector<16x32xf32> to vector<1x16x32xf32>
    tpu.vector_store %arg19[%c0_153, %c0_154, %c0_155], %365 {strides = array<i32>} : memref<1x16x32xf32, #tpu.memory_space<vmem>>, vector<1x16x32xf32>,
    return
  }
  func.func @transform_0(%arg0: i32) -> (i32, i32, i32) {
    %c0_i32 = arith.constant 0 : i32
    %c0_i32_0 = arith.constant 0 : i32
    %c0_i32_1 = arith.constant 0 : i32
    return %arg0, %c0_i32, %c0_i32_0 : i32, i32, i32
  }
  func.func @transform_1(%arg0: i32) -> (i32, i32) {
    %c0_i32 = arith.constant 0 : i32
    %c0_i32_0 = arith.constant 0 : i32
    %c0_i32_1 = arith.constant 0 : i32
    return %c0_i32, %c0_i32_0 : i32, i32
  }
  func.func @transform_2(%arg0: i32) -> (i32, i32) {
    %c0_i32 = arith.constant 0 : i32
    %c0_i32_0 = arith.constant 0 : i32
    %c0_i32_1 = arith.constant 0 : i32
    return %c0_i32, %c0_i32_0 : i32, i32
  }
  func.func @transform_3(%arg0: i32) -> (i32, i32) {
    %c0_i32 = arith.constant 0 : i32
    %c0_i32_0 = arith.constant 0 : i32
    %c0_i32_1 = arith.constant 0 : i32
    return %c0_i32, %c0_i32_0 : i32, i32
  }
  func.func @transform_4(%arg0: i32) -> (i32, i32) {
    %c0_i32 = arith.constant 0 : i32
    %c0_i32_0 = arith.constant 0 : i32
    %c0_i32_1 = arith.constant 0 : i32
    return %c0_i32, %c0_i32_0 : i32, i32
  }
  func.func @transform_5(%arg0: i32) -> (i32, i32, i32) {
    %c0_i32 = arith.constant 0 : i32
    %c0_i32_0 = arith.constant 0 : i32
    %c0_i32_1 = arith.constant 0 : i32
    %c0_i32_2 = arith.constant 0 : i32
    return %c0_i32, %c0_i32_0, %c0_i32_1 : i32, i32, i32
  }
  func.func @transform_6(%arg0: i32) -> (i32, i32, i32) {
    %c0_i32 = arith.constant 0 : i32
    %c0_i32_0 = arith.constant 0 : i32
    %c0_i32_1 = arith.constant 0 : i32
    %c0_i32_2 = arith.constant 0 : i32
    return %c0_i32, %c0_i32_0, %c0_i32_1 : i32, i32, i32
  }
  func.func @transform_7(%arg0: i32) -> (i32, i32, i32) {
    %c0_i32 = arith.constant 0 : i32
    %c0_i32_0 = arith.constant 0 : i32
    %c0_i32_1 = arith.constant 0 : i32
    %c0_i32_2 = arith.constant 0 : i32
    return %c0_i32, %c0_i32_0, %c0_i32_1 : i32, i32, i32
  }
  func.func @transform_8(%arg0: i32) -> (i32, i32, i32) {
    %c0_i32 = arith.constant 0 : i32
    %c0_i32_0 = arith.constant 0 : i32
    %c0_i32_1 = arith.constant 0 : i32
    %c0_i32_2 = arith.constant 0 : i32
    return %c0_i32, %c0_i32_0, %c0_i32_1 : i32, i32, i32
  }
  func.func @transform_9(%arg0: i32) -> (i32, i32, i32) {
    %c0_i32 = arith.constant 0 : i32
    %c0_i32_0 = arith.constant 0 : i32
    %c0_i32_1 = arith.constant 0 : i32
    %c0_i32_2 = arith.constant 0 : i32
    return %c0_i32, %c0_i32_0, %c0_i32_1 : i32, i32, i32
  }
  func.func @transform_10(%arg0: i32) -> (i32, i32, i32) {
    %c0_i32 = arith.constant 0 : i32
    %c0_i32_0 = arith.constant 0 : i32
    %c0_i32_1 = arith.constant 0 : i32
    %c0_i32_2 = arith.constant 0 : i32
    return %c0_i32, %c0_i32_0, %c0_i32_1 : i32, i32, i32
  }
  func.func @transform_11(%arg0: i32) -> (i32, i32, i32) {
    %c0_i32 = arith.constant 0 : i32
    %c0_i32_0 = arith.constant 0 : i32
    %c0_i32_1 = arith.constant 0 : i32
    %c0_i32_2 = arith.constant 0 : i32
    return %c0_i32, %c0_i32_0, %c0_i32_1 : i32, i32, i32
  }
  func.func @transform_12(%arg0: i32) -> (i32, i32, i32) {
    %c0_i32 = arith.constant 0 : i32
    %c0_i32_0 = arith.constant 0 : i32
    %c0_i32_1 = arith.constant 0 : i32
    %c0_i32_2 = arith.constant 0 : i32
    return %c0_i32, %c0_i32_0, %c0_i32_1 : i32, i32, i32
  }
  func.func @transform_13(%arg0: i32) -> (i32, i32, i32) {
    %c0_i32 = arith.constant 0 : i32
    %c0_i32_0 = arith.constant 0 : i32
    %c0_i32_1 = arith.constant 0 : i32
    %c0_i32_2 = arith.constant 0 : i32
    return %c0_i32, %c0_i32_0, %c0_i32_1 : i32, i32, i32
  }
  func.func @transform_14(%arg0: i32) -> (i32, i32, i32) {
    %c0_i32 = arith.constant 0 : i32
    %c0_i32_0 = arith.constant 0 : i32
    %c0_i32_1 = arith.constant 0 : i32
    %c0_i32_2 = arith.constant 0 : i32
    return %c0_i32, %c0_i32_0, %c0_i32_1 : i32, i32, i32
  }
  func.func @transform_15(%arg0: i32) -> (i32, i32, i32) {
    %c0_i32 = arith.constant 0 : i32
    %c0_i32_0 = arith.constant 0 : i32
    %c0_i32_1 = arith.constant 0 : i32
    %c0_i32_2 = arith.constant 0 : i32
    return %c0_i32, %c0_i32_0, %c0_i32_1 : i32, i32, i32
  }
  func.func @transform_16(%arg0: i32) -> (i32, i32) {
    %c0_i32 = arith.constant 0 : i32
    %c0_i32_0 = arith.constant 0 : i32
    %c0_i32_1 = arith.constant 0 : i32
    return %c0_i32, %c0_i32_0 : i32, i32
  }
  func.func @transform_17(%arg0: i32) -> (i32, i32) {
    %c0_i32 = arith.constant 0 : i32
    %c0_i32_0 = arith.constant 0 : i32
    %c0_i32_1 = arith.constant 0 : i32
    return %c0_i32, %c0_i32_0 : i32, i32
  }
  func.func @transform_18(%arg0: i32) -> (i32, i32, i32) {
    %c0_i32 = arith.constant 0 : i32
    %c0_i32_0 = arith.constant 0 : i32
    %c0_i32_1 = arith.constant 0 : i32
    return %arg0, %c0_i32, %c0_i32_0 : i32, i32, i32
  }
}

</mosaic_0001>

<bundles_post_ra>
// kernel: tpu_custom_call.1
= control target key start
LH: loop header
LB: loop body
LE: loop exit
PB: predicated region body
PF: predicated region fallthrough
CT: control target
= control target key end

     0   :  { %s4361_s0 = inlined_call_operand.vmem [shape: f32[2,16,384], index: 0, kind: input, shape index: {}]   ;;  %s4362_s1 = inlined_call_operand.vmem [shape: f32[384,32], index: 1, kind: input, shape index: {}]   ;;  %s4363_s2 = inlined_call_operand.vmem [shape: f32[16,32], index: 2, kind: input, shape index: {}]   ;;  %s4364_s3 = inlined_call_operand.vmem [shape: f32[1,64], index: 3, kind: input, shape index: {}]   ;;  %s4365_s4 = inlined_call_operand.vmem [shape: f32[64,64], index: 4, kind: input, shape index: {}]   ;;  %s4366_s5 = inlined_call_operand.vmem [shape: f32[2,1,32], index: 5, kind: input, shape index: {}]   ;;  %s4367_s6 = inlined_call_operand.vmem [shape: f32[2,1,32], index: 6, kind: input, shape index: {}]   ;;  %s4368_s7 = inlined_call_operand.vmem [shape: f32[2,32,96], index: 7, kind: input, shape index: {}]   ;;  %s4369_s8 = inlined_call_operand.vmem [shape: f32[2,32,32], index: 8, kind: input, shape index: {}]   ;;  %s4370_s9 = inlined_call_operand.vmem [shape: f32[2,1,32], index: 9, kind: input, shape index: {}]   ;;  %s4371_s10 = inlined_call_operand.vmem [shape: f32[2,1,32], index: 10, kind: input, shape index: {}]   ;;  %s4372_s11 = inlined_call_operand.vmem [shape: f32[2,1,32], index: 11, kind: input, shape index: {}]   ;;  %s4373_s12 = inlined_call_operand.vmem [shape: f32[2,32,128], index: 12, kind: input, shape index: {}]   ;;  %s4374_s13 = inlined_call_operand.vmem [shape: f32[2,1,128], index: 13, kind: input, shape index: {}]   ;;  %s4375_s14 = inlined_call_operand.vmem [shape: f32[2,128,32], index: 14, kind: input, shape index: {}]   ;;  %s4376_s15 = inlined_call_operand.vmem [shape: f32[2,1,32], index: 15, kind: input, shape index: {}]   ;;  %s4377_s16 = inlined_call_operand.vmem [shape: f32[1,32], index: 16, kind: input, shape index: {}]   ;;  %s4378_s17 = inlined_call_operand.vmem [shape: f32[1,32], index: 17, kind: input, shape index: {}]   ;;  %s4379_s18 = inlined_call_operand.hbm [shape: f32[2,16,32], index: 18, kind: output, shape index: {}]  }
   0x1   :  { %4391 = sst [smem:[#allocation12_spill]] %s4361_s0 }
   0x2   :  { %4392 = sst [smem:[#allocation13_spill]] %s4362_s1 }
   0x3   :  { %4393 = sst [smem:[#allocation14_spill]] %s4363_s2 }
   0x4   :  { %4394 = sst [smem:[#allocation15_spill]] %s4364_s3 }
   0x5   :  { %4395 = sst [smem:[#allocation16_spill]] %s4365_s4 }
   0x6   :  { %4396 = sst [smem:[#allocation17_spill]] %s4379_s18 }
   0x7   :  { %23 = vsyncpa [#allocation3], 0 }
   0x8   :  { %25 = vsyncpa [#allocation3 + $0x1], 0  ;;  %s3552_s27 = smov 0   ;;  %s3554_s28 = smov 0  }
   0x9   :  { %s3556_s29 = smov 0   ;;  %s3558_s30 = smov 0  }
   0xa LB: > { %4397 = sst [smem:[#allocation5_spill]] %s3436_s27  ;;  %s3573_s0 = sadd.s32 4294967295, %s3448_s30   ;;  %s3448_s30 = sphi %s3558_s30, %s4417_s30   ;;  %s3444_s29 = sphi %s3556_s29, %s4419_s29   ;;  %s3440_s28 = sphi %s3554_s28, %s4421_s28   ;;  %s3436_s27 = sphi %s3552_s27, %s4420_s27  }
   0xb   : > { %4398 = sst [smem:[#allocation6_spill]] %s3444_s29  ;;  %s2709_s19 = sadd.s32 4294967294, %s3448_s30  }
   0xc   : > { %4399 = sst [smem:[#allocation7_spill]] %s3448_s30  ;;  %s3577_s1 = sadd.s32 1, %s3448_s30  }
   0xd   : > { %4400 = sst [smem:[#allocation8_spill]] %s3577_s1  ;;  %s421_s20 = sadd.s32 1, %s3444_s29 }
   0xe   : > { %s418_s21 = ssub.s32 %s3448_s30, %s3577_s1  ;;  %p431_p0 = scmp.ne.s32.totalorder %s3444_s29, %s3440_s28 }
   0xf   : > { %p419_p1 = scmp.eq.s32.totalorder %s418_s21, 0  ;;  %p432_p2 = scmp.eq.s32.totalorder %s3573_s0, 1 }
  0x10   : > { %p437_p3 = scmp.ne.s32.totalorder %s3440_s28, %s3436_s27  ;;  %p438_p4 = scmp.eq.s32.totalorder %s2709_s19, 1 }
  0x11   : > { %s3588_s22 = scalar_select %p419_p1, %s3444_s29, %s421_s20  }
  0x12   : > { %p3590_p5 = por %p432_p2, %p431_p0  ;;  %p3594_p6 = por %p438_p4, %p437_p3 }
  0x13   : > { %4401 = sst [smem:[#allocation9_spill]] %s3588_s22  ;;  %p2712_p7 = scmp.ge.s32.totalorder %s3448_s30, 1 }
  0x14   : > { %s4402_s2 = scalar_select %p3590_p5, 1, 0 }
  0x15   : > { %s4404_s23 = scalar_select %p3594_p6, 1, 0 }
  0x16   : > { %4403 = sst [smem:[#allocation10_spill]] %s4402_s2  ;;  %p515_p8 = scmp.lt.s32.totalorder %s3448_s30, 3 }
  0x17   : > { %4405 = sst [smem:[#allocation11_spill]] %s4404_s23 }
  0x18   : > { %p516_p9 = pnand %p2712_p7, %p515_p8 }
  0x19   : > { %s4406_s26 = sld [smem:[#allocation13_spill]] (!%p516_p9)  ;;  %p569_p10 = scmp.lt.s32.totalorder (!%p516_p9), %s3573_s0, 1 }
  0x1a   : > { %519 = sbr.rel (%p516_p9) target bundleno = 5336 (0x14d8), region = 92  ;;  %s4407_s27 = sld [smem:[#allocation12_spill]] (!%p516_p9) }
  0x1b   : > { %s4408_s30 = sld [smem:[#allocation14_spill]] (!%p516_p9)  ;;  %s3452_s22 = smov (!%p516_p9), 96  }
  0x1c   : > { %s4410_s3 = sld [smem:[#allocation15_spill]] (!%p516_p9)  ;;  %s2816_s18 = sshll.u32 (!%p516_p9), %s3573_s0, 8 }
  0x1d   : > { %s4411_s4 = sld [smem:[#allocation16_spill]] (!%p516_p9) }
  0x1f   : > { %v611_v0 = vld [vmem:[%s4406_s26 + $0xf8] sm:$0xff]  ;;  %v610_v2 = vld [vmem:[%s4406_s26 + $0xf0] sm:$0xff]  ;;  %v609_v5 = vld [vmem:[%s4406_s26 + $0xe8] sm:$0xff]  ;;  %s3694_s24 = scalar_select %p569_p10, %s3573_s0, 1  ;;  %vm813_vm0 = vcmask 261120   ;;  %vm1113_vm11 = vcmask 523264  }
  0x20   : > { %v595_v1 = vld [vmem:[%s4406_s26 + $0x78] sm:$0xff]  ;;  %2817 = vmatprep.subr.mxu0 %v611_v0  ;;  %v594_v4 = vld [vmem:[%s4406_s26 + $0x70] sm:$0xff]  ;;  %v593_v7 = vld [vmem:[%s4406_s26 + $0x68] sm:$0xff] }
  0x21   : > { %v627_v3 = vld [vmem:[%s4406_s26 + $0x178] sm:$0xff]  ;;  %2818 = vmatpush3.msra.mxu0 %v595_v1  ;;  %v626_v6 = vld [vmem:[%s4406_s26 + $0x170] sm:$0xff]  ;;  %v625_v8 = vld [vmem:[%s4406_s26 + $0x168] sm:$0xff]  ;;  %s3290_s19 = smul.u32 48, %s3694_s24  ;;  %s4409_s24 = smov %s4408_s30 }
  0x22   : > { %3005 = vmatprep.subr.mxu1 %v627_v3  ;;  %2819 = vmatprep.subr.mxu0 %v610_v2  ;;  %v608_v9 = vld [vmem:[%s4406_s26 + $0xe0] sm:$0xff]  ;;  %v607_v12 = vld [vmem:[%s4406_s26 + $0xd8] sm:$0xff]  ;;  %v606_v15 = vld [vmem:[%s4406_s26 + $0xd0] sm:$0xff] }
  0x23   : > { %3006 = vmatpush3.msra.mxu1 %v627_v3  ;;  %2820 = vmatpush3.msra.mxu0 %v594_v4  ;;  %v592_v10 = vld [vmem:[%s4406_s26 + $0x60] sm:$0xff]  ;;  %v591_v13 = vld [vmem:[%s4406_s26 + $0x58] sm:$0xff]  ;;  %v590_v16 = vld [vmem:[%s4406_s26 + $0x50] sm:$0xff]  ;;  %s573_s23 = scalar_lea.vmem %s4407_s27, %s3290_s19  ;;  %s3451_s27 = smov 32  }
  0x24   : > { %3007 = vmatprep.subr.mxu1 %v626_v6  ;;  %2821 = vmatprep.subr.mxu0 %v609_v5  ;;  %v624_v11 = vld [vmem:[%s4406_s26 + $0x160] sm:$0xff]  ;;  %v623_v14 = vld [vmem:[%s4406_s26 + $0x158] sm:$0xff]  ;;  %v622_v17 = vld [vmem:[%s4406_s26 + $0x150] sm:$0xff] }
  0x25   : > { %3008 = vmatpush3.msra.mxu1 %v626_v6  ;;  %2822 = vmatpush3.msra.mxu0 %v593_v7  ;;  %v605_v18 = vld [vmem:[%s4406_s26 + $0xc8] sm:$0xff]  ;;  %v604_v21 = vld [vmem:[%s4406_s26 + $0xc0] sm:$0xff]  ;;  %v603_v24 = vld [vmem:[%s4406_s26 + $0xb8] sm:$0xff] }
  0x26   : > { %3009 = vmatprep.subr.mxu1 %v625_v8  ;;  %2823 = vmatprep.subr.mxu0 %v608_v9  ;;  %v589_v19 = vld [vmem:[%s4406_s26 + $0x48] sm:$0xff]  ;;  %v588_v22 = vld [vmem:[%s4406_s26 + $0x40] sm:$0xff]  ;;  %v587_v25 = vld [vmem:[%s4406_s26 + $0x38] sm:$0xff] }
  0x27   : > { %3010 = vmatpush3.msra.mxu1 %v625_v8  ;;  %2824 = vmatpush3.msra.mxu0 %v592_v10  ;;  %v621_v20 = vld [vmem:[%s4406_s26 + $0x148] sm:$0xff]  ;;  %v620_v23 = vld [vmem:[%s4406_s26 + $0x140] sm:$0xff]  ;;  %v619_v26 = vld [vmem:[%s4406_s26 + $0x138] sm:$0xff] }
  0x28   : > { %3011 = vmatprep.subr.mxu1 %v624_v11  ;;  %2825 = vmatprep.subr.mxu0 %v607_v12  ;;  %v602_v27 = vld [vmem:[%s4406_s26 + $0xb0] sm:$0xff]  ;;  %v601_v30 = vld [vmem:[%s4406_s26 + $0xa8] sm:$0xff]  ;;  %v600_v33 = vld [vmem:[%s4406_s26 + $0xa0] sm:$0xff] }
  0x29   : > { %3012 = vmatpush3.msra.mxu1 %v624_v11  ;;  %2826 = vmatpush3.msra.mxu0 %v591_v13  ;;  %v586_v28 = vld [vmem:[%s4406_s26 + $0x30] sm:$0xff]  ;;  %v585_v31 = vld [vmem:[%s4406_s26 + $0x28] sm:$0xff]  ;;  %v584_v34 = vld [vmem:[%s4406_s26 + $0x20] sm:$0xff] }
  0x2a   : > { %3013 = vmatprep.subr.mxu1 %v623_v14  ;;  %2827 = vmatprep.subr.mxu0 %v606_v15  ;;  %v618_v29 = vld [vmem:[%s4406_s26 + $0x130] sm:$0xff]  ;;  %v617_v32 = vld [vmem:[%s4406_s26 + $0x128] sm:$0xff]  ;;  %v616_v35 = vld [vmem:[%s4406_s26 + $0x120] sm:$0xff] }
  0x2b   : > { %3014 = vmatpush3.msra.mxu1 %v623_v14  ;;  %2828 = vmatpush3.msra.mxu0 %v590_v16  ;;  %v599_v36 = vld [vmem:[%s4406_s26 + $0x98] sm:$0xff]  ;;  %v598_v39 = vld [vmem:[%s4406_s26 + $0x90] sm:$0xff]  ;;  %v597_v42 = vld [vmem:[%s4406_s26 + $0x88] sm:$0xff] }
  0x2c   : > { %3015 = vmatprep.subr.mxu1 %v622_v17  ;;  %2829 = vmatprep.subr.mxu0 %v605_v18  ;;  %v583_v37 = vld [vmem:[%s4406_s26 + $0x18] sm:$0xff]  ;;  %v582_v40 = vld [vmem:[%s4406_s26 + $0x10] sm:$0xff]  ;;  %v581_v43 = vld [vmem:[%s4406_s26 + $0x8] sm:$0xff] }
  0x2d   : > { %3016 = vmatpush3.msra.mxu1 %v622_v17  ;;  %2830 = vmatpush3.msra.mxu0 %v589_v19  ;;  %v615_v38 = vld [vmem:[%s4406_s26 + $0x118] sm:$0xff]  ;;  %v614_v41 = vld [vmem:[%s4406_s26 + $0x110] sm:$0xff]  ;;  %v613_v44 = vld [vmem:[%s4406_s26 + $0x108] sm:$0xff] }
  0x2e   : > { %3017 = vmatprep.subr.mxu1 %v621_v20  ;;  %2831 = vmatprep.subr.mxu0 %v604_v21  ;;  %v596_v45 = vld [vmem:[%s4406_s26 + $0x80] sm:$0xff]  ;;  %v575_v46 = vld [vmem:[%s573_s23 + $0x8] sm:$0xff]  ;;  %v576_v50 = vld [vmem:[%s573_s23 + $0x10] sm:$0xff] }
  0x2f   : > { %3018 = vmatpush3.msra.mxu1 %v621_v20  ;;  %2832 = vmatpush3.msra.mxu0 %v588_v22  ;;  %v580_v47 = vld [vmem:[%s4406_s26] sm:$0xff]  ;;  %v579_v51 = vld [vmem:[%s573_s23 + $0x28] sm:$0xff]  ;;  %v577_v53 = vld [vmem:[%s573_s23 + $0x18] sm:$0xff]  ;;  %v780_v20 = vlaneseq  ;;  %v3450_v22 = vmov 0.0  }
  0x30   : > { %3019 = vmatprep.subr.mxu1 %v620_v23  ;;  %2833 = vmatprep.subr.mxu0 %v603_v24  ;;  %v574_v48 = vld [vmem:[%s573_s23] sm:$0xff]  ;;  %v629_v62 = vld [vmem:[%s4409_s24 + $0x8] sm:$0xff]  ;;  %v860_v16 = vld [vmem:[%s4368_s7 + $0x18] sm:$0xff] }
  0x31   : > { %3020 = vmatpush3.msra.mxu1 %v620_v23  ;;  %2834 = vmatpush3.msra.mxu0 %v587_v25  ;;  %v612_v49 = vld [vmem:[%s4406_s26 + $0x100] sm:$0xff]  ;;  %v859_v17 = vld [vmem:[%s4368_s7 + $0x10] sm:$0xff]  ;;  %v858_v18 = vld [vmem:[%s4368_s7 + $0x8] sm:$0xff]  ;;  %v781_v21 = vand.u32 127, %v780_v20 }
  0x32   : > { %3021 = vmatprep.subr.mxu1 %v619_v26  ;;  %2835 = vmatprep.subr.mxu0 %v602_v27  ;;  %v578_v52 = vld [vmem:[%s573_s23 + $0x20] sm:$0xff] }
  0x33   : > { %3022 = vmatpush3.msra.mxu1 %v619_v26  ;;  %2836 = vmatpush3.msra.mxu0 %v586_v28  ;;  %v628_v57 = vld [vmem:[%s4408_s30] sm:$0xff]  ;;  %vm792_vm1 = vcmp.ge.s32.totalorder %v781_v21, 16  ;;  %vm793_vm2 = vcmp.lt.s32.totalorder %v781_v21, 24  ;;  %vm787_vm3 = vcmp.ge.s32.totalorder %v781_v21, 8  ;;  %vm788_vm4 = vcmp.lt.s32.totalorder %v781_v21, 16  ;;  %s566_s30 = sand.u32 1, %s3440_s28  }
  0x34   : > { %3023 = vmatprep.subr.mxu1 %v618_v29  ;;  %2837 = vmatprep.subr.mxu0 %v601_v30  ;;  %v857_v19 = vld [vmem:[%s4368_s7] sm:$0xff]  ;;  %vm794_vm5 = vmand %vm792_vm1, %vm793_vm2  ;;  %vm797_vm6 = vcmp.ge.s32.totalorder %v781_v21, 24  ;;  %vm798_vm7 = vcmp.lt.s32.totalorder %v781_v21, 32  ;;  %vm783_vm10 = vcmp.lt.s32.totalorder %v781_v21, 8  ;;  %s2713_s25 = sshll.u32 %s566_s30, 4  ;;  %s4321_s0 = scalar_lea.sflag [#allocation3], %s566_s30 }
  0x35   : > { %3024 = vmatpush3.msra.mxu1 %v618_v29  ;;  %2838 = vmatpush3.msra.mxu0 %v585_v31  ;;  %v3784_v23 = vsel %vm794_vm5, 1.0, %v3450_v22  ;;  %vm789_vm8 = vmand %vm787_vm3, %vm788_vm4  ;;  %v3793_v26 = vsel %vm783_vm10, 1.0, %v3450_v22  ;;  %s568_s2 = scalar_lea.vmem [#allocation2], %s2713_s25 }
  0x36   : > { %3025 = vmatprep.subr.mxu1 %v617_v32  ;;  %2839 = vmatprep.subr.mxu0 %v600_v33  ;;  %vm799_vm9 = vmand %vm797_vm6, %vm798_vm7  ;;  %v3787_v24 = vsel %vm789_vm8, 1.0, %v3450_v22  ;;  %s2647_s20 = sshll.u32 %s568_s2, 4  ;;  %s4317_s20 = int_to_ptr.vmem [resolvable:$true] %s2647_s20 }
  0x37   : > { %3026 = vmatpush3.msra.mxu1 %v617_v32  ;;  %2840 = vmatpush3.msra.mxu0 %v584_v34  ;;  %v3789_v25 = vsel %vm799_vm9, 1.0, %v3450_v22  ;;  %v2719_v34 = vld [vmem:[%s4366_s5] ss:$0 sm:$0xff]  ;;  %s3388_s25 = scalar_lea.vmem %s4317_s20, 256 }
  0x38   : > { %3027 = vmatprep.subr.mxu1 %v616_v35  ;;  %2841 = vmatprep.subr.mxu0 %v599_v36  ;;  %v2720_v36 = vld [vmem:[%s4367_s6] ss:$0 sm:$0xff]  ;;  %p3389_p11 = scmp.ne.s32.totalorder %s4317_s20, %s3388_s25 }
  0x39   : > { %3028 = vmatpush3.msra.mxu1 %v616_v35  ;;  %2842 = vmatpush3.msra.mxu0 %v583_v37 }
  0x3a   : > { %3029 = vmatprep.subr.mxu1 %v615_v38  ;;  %2843 = vmatprep.subr.mxu0 %v598_v39  ;;  %p3390_p12 = pnand %p3389_p11, %p3590_p5 }
  0x3b   : > { %3030 = vmatpush3.msra.mxu1 %v615_v38  ;;  %2844 = vmatpush3.msra.mxu0 %v582_v40 }
  0x3c   : > { %3031 = vmatprep.subr.mxu1 %v614_v41  ;;  %2845 = vmatprep.subr.mxu0 %v597_v42  ;;  %p3391_p13 = pneg %p3390_p12 }
  0x3d   : > { %3032 = vmatpush3.msra.mxu1 %v614_v41  ;;  %2846 = vmatpush3.msra.mxu0 %v581_v43 }
  0x3e   : > { %3033 = vmatprep.subr.mxu1 %v613_v44  ;;  %2847 = vmatprep.subr.mxu0 %v596_v45 }
  0x3f   : > { %694 = vmatprep.mubr.f32.mxu0 %v575_v46  ;;  %2848 = vmatpush3.msra.mxu0 %v580_v47 }
  0x40   : > { %3034 = vmatpush3.msra.mxu1 %v613_v44  ;;  %695 = vmatmul.mubr.f32.vlgmr.msra.gmra.mxu0 %v574_v48 }
  0x41   : > { %3035 = vmatprep.subr.mxu1 %v612_v49  ;;  %3037 = vmatprep.mubr.f32.mxu1 %v576_v50 }
  0x42   : > { %3036 = vmatpush3.msra.mxu1 %v612_v49  ;;  %699 = vmatprep.mubr.f32.mxu0 %v578_v52 }
  0x43   : > { %3038 = vmatmul.mubr.f32.vlgmr.msra.gmra.mxu1 %v579_v51  ;;  %3040 = vmatprep.subr.mxu0 %v860_v16 }
  0x44   : > { %700 = vmatmul.mubr.f32.gmra.mxu0 %v577_v53 }
  0x45   : > { %3041 = vmatpush3.msra.mxu0 %v860_v16  ;;  %v3919_v16 = vld [vmem:[%s4411_s4 + $0x8] sm:$0xff] }
  0x46   : > { %3042 = vmatprep.subr.mxu0 %v859_v17 }
  0x47   : > { %3043 = vmatpush3.msra.mxu0 %v859_v17  ;;  %v3925_v17 = vld [vmem:[%s4411_s4] sm:$0xff] }
  0x48   : > { %3044 = vmatprep.subr.mxu0 %v858_v18 }
  0x49   : > { %3045 = vmatpush3.msra.mxu0 %v858_v18 }
  0x4a   : > { %3046 = vmatprep.subr.mxu0 %v857_v19 }
  0x4b   : > { %3047 = vmatpush3.msra.mxu0 %v857_v19 }
 0x100   : > { %v2849_v54 = vpop.f32.mrf.mxu0 }
 0x102   : > { %v2850_v55 = vpop.f32.mrf.mxu0 }
 0x103   : > { %v3039_v56 = vpop.f32.mrf.mxu1  ;;  %v2851_v58 = vadd.f32 %v2850_v55, %v2849_v54 }
 0x104   : > { %v2852_v59 = vpop.f32.mrf.mxu0 }
 0x105   : > { %v697_v60 = vadd.f32 %v2851_v58, %v628_v57  ;;  %v771_v61 = vpop.f32.mrf.mxu1 }
 0x106   : > { %v2853_v63 = vpop.f32.mrf.mxu0 }
 0x107   : > { %v3760_v0 = vadd.f32 %v771_v61, %v697_v60  ;;  %v2854_v1 = vadd.f32 %v2853_v63, %v2852_v59 }
 0x109   : > { %v702_v2 = vadd.f32 %v2854_v1, %v629_v62  ;;  %v814_v3 = vsel %vm813_vm0, %v3760_v0, 0.0 }
 0x10a   : > { %815 = vadd.xlane.f32.xlu0 %v814_v3 }
 0x10b   : > { %v3764_v4 = vadd.f32 %v3039_v56, %v702_v2  ;;  %v3863_v2 = vld [vmem:[%s4410_s3] ss:$0 sm:$0xff]  ;;  %s4413_s3 = sld [smem:[#allocation17_spill]] }
 0x10d   : > { %v817_v5 = vsel %vm813_vm0, %v3764_v4, 0.0 }
 0x10e   : > { %818 = vadd.xlane.f32.xlu0 %v817_v5 }
 0x124   : > { %961 = vrot.lane.b32.xlu0 %v3789_v25, %s3451_s27 }
 0x193   : > { %v816_v6 = vpop.xlane.xlu0 %815 }
 0x194   : > { %v821_v7 = vmul.f32 0.03125, %v816_v6 }
 0x196   : > { %v823_v8 = vsub.f32 %v3760_v0, %v821_v7 }
 0x197   : > { %v819_v9 = vpop.xlane.xlu0 %818 }
 0x198   : > { %v822_v10 = vmul.f32 0.03125, %v819_v9  ;;  %v825_v11 = vmul.f32 %v823_v8, %v823_v8 }
 0x19a   : > { %v824_v12 = vsub.f32 %v3764_v4, %v822_v10  ;;  %v827_v13 = vsel %vm813_vm0, %v825_v11, 0.0  ;;  %v3872_v10 = vld [vmem:[%s4411_s4 + $0x38] sm:$0xff]  ;;  %v3878_v11 = vld [vmem:[%s4411_s4 + $0x30] sm:$0xff] }
 0x19b   : > { %828 = vadd.xlane.f32.xlu1 %v827_v13  ;;  %v3806_v44 = vpop.permute.xlu0 %961  ;;  %v3893_v13 = vld [vmem:[%s4411_s4 + $0x20] sm:$0xff] }
 0x19c   : > { %v826_v14 = vmul.f32 %v824_v12, %v824_v12 }
 0x19e   : > { %v830_v15 = vsel %vm813_vm0, %v826_v14, 0.0  ;;  %v3903_v14 = vld [vmem:[%s4411_s4 + $0x18] sm:$0xff] }
 0x19f   : > { %831 = vadd.xlane.f32.xlu1 %v830_v15  ;;  %v3909_v15 = vld [vmem:[%s4411_s4 + $0x10] sm:$0xff] }
 0x1b0   : > { %955 = vrot.lane.b32.xlu1 %v3784_v23, %s3451_s27 }
 0x1b4   : > { %949 = vrot.lane.b32.xlu1 %v3787_v24, %s3451_s27 }
 0x1b8   : > { %943 = vrot.lane.b32.xlu1 %v3793_v26, %s3451_s27  ;;  %s3453_s27 = smov 64  }
 0x224   : > { %v829_v27 = vpop.xlane.xlu1 %828 }
 0x225   : > { %v833_v28 = vmul.f32 0.03125, %v829_v27 }
 0x227   : > { %v835_v29 = vadd.f32 1e-05, %v833_v28 }
 0x228   : > { %v832_v30 = vpop.xlane.xlu1 %831 }
 0x229   : > { %3336 = vrsqrt.f32 %v835_v29  ;;  %v834_v31 = vmul.f32 0.03125, %v832_v30 }
 0x22b   : > { %v836_v32 = vadd.f32 1e-05, %v834_v31 }
 0x22c   : > { %v3804_v43 = vpop.permute.xlu1 %955 }
 0x22d   : > { %3338 = vrsqrt.f32 %v836_v32 }
 0x230   : > { %v3819_v49 = vpop.permute.xlu1 %949 }
 0x234   : > { %v3830_v53 = vpop.permute.xlu1 %943 }
 0x236   : > { %v3337_v33 = vpop.eup %3336 }
 0x237   : > { %v839_v35 = vmul.f32 %v3337_v33, %v823_v8 }
 0x239   : > { %v847_v37 = vmul.f32 %v2719_v34, %v839_v35 }
 0x23a   : > { %v3339_v38 = vpop.eup %3338 }
 0x23b   : > { %v840_v39 = vmul.f32 %v3339_v38, %v824_v12  ;;  %v855_v40 = vadd.f32 %v2720_v36, %v847_v37  ;;  %v3887_v12 = vld [vmem:[%s4411_s4 + $0x28] sm:$0xff]  ;;  %v1327_v38 = vld [vmem:[%s4369_s8 + $0x18] sm:$0xff]  ;;  %s4315_s4 = scalar_lea.hbm %s4413_s3, %s2816_s18 }
 0x23d   : > { %v848_v41 = vmul.f32 %v2719_v34, %v840_v39  ;;  %3048 = vmatprep.mubr.msk.f32.mxu0 %vm813_vm0, %v855_v40  ;;  %v1326_v39 = vld [vmem:[%s4369_s8 + $0x10] sm:$0xff] }
 0x23f   : > { %v856_v42 = vadd.f32 %v2720_v36, %v848_v41 }
 0x241   : > { %3049 = vmatmul.mubr.msk.f32.vlgmr.msra.gmra.mxu0 %vm813_vm0, %v856_v42 }
 0x301   : > { %v3808_v45 = vpop.f32.mrf.mxu0 }
 0x302   : > { %v965_v46 = vmul.f32 %v3808_v45, %v3806_v44  ;;  %v959_v50 = vmul.f32 %v3808_v45, %v3804_v43  ;;  %v953_v52 = vmul.f32 %v3808_v45, %v3819_v49  ;;  %v947_v55 = vmul.f32 %v3808_v45, %v3830_v53 }
 0x303   : > { %v3812_v47 = vpop.f32.mrf.mxu0 }
 0x304   : > { %3067 = vmatprep.mubr.msk.f32.mxu1 %vm813_vm0, %v3812_v47  ;;  %1014 = vrot.lane.b32.xlu0 %v965_v46, %s3452_s22  ;;  %v964_v48 = vmul.f32 %v3806_v44, %v3812_v47  ;;  %v958_v51 = vmul.f32 %v3804_v43, %v3812_v47  ;;  %v952_v54 = vmul.f32 %v3819_v49, %v3812_v47 }
 0x305   : > { %v946_v56 = vmul.f32 %v3830_v53, %v3812_v47 }
 0x306   : > { %1012 = vrot.lane.b32.xlu1 %v964_v48, %s3452_s22 }
 0x308   : > { %1010 = vrot.lane.b32.xlu0 %v959_v50, %s3452_s22 }
 0x30a   : > { %1008 = vrot.lane.b32.xlu1 %v958_v51, %s3452_s22 }
 0x30c   : > { %1006 = vrot.lane.b32.xlu0 %v953_v52, %s3452_s22 }
 0x30e   : > { %1004 = vrot.lane.b32.xlu1 %v952_v54, %s3452_s22 }
 0x310   : > { %1002 = vrot.lane.b32.xlu0 %v947_v55, %s3452_s22 }
 0x312   : > { %1000 = vrot.lane.b32.xlu1 %v946_v56, %s3452_s22 }
 0x376   : > { %v1015_v57 = vpop.permute.xlu0 %1014 }
 0x377   : > { %3051 = vmatprep.subr.msk.mxu1 %vm813_vm0, %v1015_v57 }
 0x378   : > { %3052 = vmatpush3.xpose.msk.msra.mxu1 %vm813_vm0, %v1015_v57  ;;  %v1013_v58 = vpop.permute.xlu1 %1012 }
 0x379   : > { %3053 = vmatprep.subr.msk.mxu1 %vm813_vm0, %v1013_v58 }
 0x37a   : > { %v1011_v59 = vpop.permute.xlu0 %1010 }
 0x37c   : > { %3054 = vmatpush3.xpose.msk.msra.mxu1 %vm813_vm0, %v1013_v58  ;;  %v1009_v60 = vpop.permute.xlu1 %1008  ;;  %v1325_v58 = vld [vmem:[%s4369_s8 + $0x8] sm:$0xff] }
 0x37d   : > { %3055 = vmatprep.subr.msk.mxu1 %vm813_vm0, %v1011_v59 }
 0x37e   : > { %v1007_v61 = vpop.permute.xlu0 %1006 }
 0x380   : > { %3056 = vmatpush3.xpose.msk.msra.mxu1 %vm813_vm0, %v1011_v59  ;;  %v1005_v62 = vpop.permute.xlu1 %1004  ;;  %v1324_v59 = vld [vmem:[%s4369_s8] sm:$0xff] }
 0x381   : > { %3057 = vmatprep.subr.msk.mxu1 %vm813_vm0, %v1009_v60 }
 0x382   : > { %v1003_v63 = vpop.permute.xlu0 %1002 }
 0x384   : > { %3058 = vmatpush3.xpose.msk.msra.mxu1 %vm813_vm0, %v1009_v60  ;;  %v1001_v1 = vpop.permute.xlu1 %1000 }
 0x385   : > { %3059 = vmatprep.subr.msk.mxu1 %vm813_vm0, %v1007_v61 }
 0x388   : > { %3060 = vmatpush3.xpose.msk.msra.mxu1 %vm813_vm0, %v1007_v61 }
 0x389   : > { %3061 = vmatprep.subr.msk.mxu1 %vm813_vm0, %v1005_v62 }
 0x38c   : > { %3062 = vmatpush3.xpose.msk.msra.mxu1 %vm813_vm0, %v1005_v62 }
 0x38d   : > { %3063 = vmatprep.subr.msk.mxu1 %vm813_vm0, %v1003_v63 }
 0x390   : > { %3064 = vmatpush3.xpose.msk.msra.mxu1 %vm813_vm0, %v1003_v63  ;;  %v2740_v63 = vld [vmem:[%s4370_s9] ss:$0 sm:$0xff] }
 0x391   : > { %3065 = vmatprep.subr.msk.mxu1 %vm813_vm0, %v1001_v1 }
 0x394   : > { %3066 = vmatpush3.xpose.msk.msra.mxu1 %vm813_vm0, %v1001_v1 }
 0x395   : > { %3070 = vmatprep.subr.mxu1 %v3872_v10 }
 0x397   : > { %3068 = vmatmul.mubr.msk.f32.vlgmr.msra.gmra.mxu1 %vm813_vm0, %v3808_v45 }
 0x398   : > { %3071 = vmatpush3.msra.mxu1 %v3872_v10 }
 0x399   : > { %3072 = vmatprep.subr.mxu1 %v3878_v11 }
 0x39a   : > { %3073 = vmatpush3.msra.mxu1 %v3878_v11 }
 0x39b   : > { %3074 = vmatprep.subr.mxu1 %v3887_v12 }
 0x39c   : > { %3075 = vmatpush3.msra.mxu1 %v3887_v12 }
 0x39d   : > { %3076 = vmatprep.subr.mxu1 %v3893_v13 }
 0x39e   : > { %3077 = vmatpush3.msra.mxu1 %v3893_v13 }
 0x39f   : > { %3078 = vmatprep.subr.mxu1 %v3903_v14 }
 0x3a0   : > { %3079 = vmatpush3.msra.mxu1 %v3903_v14 }
 0x3a1   : > { %3080 = vmatprep.subr.mxu1 %v3909_v15 }
 0x3a2   : > { %3081 = vmatpush3.msra.mxu1 %v3909_v15 }
 0x3a3   : > { %3082 = vmatprep.subr.mxu1 %v3919_v16 }
 0x3a4   : > { %3083 = vmatpush3.msra.mxu1 %v3919_v16 }
 0x3a5   : > { %3084 = vmatprep.subr.mxu1 %v3925_v17 }
 0x3a6   : > { %3085 = vmatpush3.msra.mxu1 %v3925_v17 }
 0x3a7   : > { %3108 = vmatprep.subr.mxu1 %v1327_v38 }
 0x457   : > { %v3069_v3 = vpop.f32.mrf.mxu1 }
 0x458   : > { %v1110_v5 = vadd.f32 %v3069_v3, %v3863_v2 }
 0x459   : > { %v1104_v6 = vpop.f32.mrf.mxu1 }
 0x45a   : > { %v1105_v7 = vadd.f32 %v3863_v2, %v1104_v6  ;;  %v1117_v8 = vsel %vm1113_vm11, %v1110_v5, -inf }
 0x45b   : > { %1118 = vmax.xlane.f32.xlu1 %v1117_v8 }
 0x45c   : > { %v1114_v9 = vsel %vm1113_vm11, %v1105_v7, -inf }
 0x45d   : > { %1115 = vmax.xlane.f32.xlu0 %v1114_v9 }
 0x46c   : > { %976 = vrot.lane.b32.xlu1 %v3784_v23, %s3453_s27 }
 0x470   : > { %966 = vrot.lane.b32.xlu1 %v3793_v26, %s3453_s27 }
 0x473   : > { %981 = vrot.lane.b32.xlu0 %v3789_v25, %s3453_s27 }
 0x477   : > { %971 = vrot.lane.b32.xlu0 %v3787_v24, %s3453_s27 }
 0x4e4   : > { %v1119_v18 = vpop.xlane.xlu1 %1118 }
 0x4e5   : > { %v1121_v19 = vsub.f32 %v1110_v5, %v1119_v18 }
 0x4e6   : > { %v1116_v20 = vpop.xlane.xlu0 %1115 }
 0x4e7   : > { %v1120_v21 = vsub.f32 %v1105_v7, %v1116_v20  ;;  %v1124_v22 = vmul.f32 1.442695, %v1121_v19 }
 0x4e8   : > { %v3939_v27 = vpop.permute.xlu1 %976 }
 0x4e9   : > { %v1122_v23 = vmul.f32 1.442695, %v1120_v21  ;;  %v980_v28 = vmul.f32 %v3808_v45, %v3939_v27  ;;  %v979_v29 = vmul.f32 %v3939_v27, %v3812_v47 }
 0x4ea   : > { %v3933_v25 = vpop.permute.xlu0 %981 }
 0x4eb   : > { %3340 = vpow2.f32 %v1122_v23  ;;  %v985_v24 = vmul.f32 %v3808_v45, %v3933_v25  ;;  %v984_v26 = vmul.f32 %v3933_v25, %v3812_v47 }
 0x4ec   : > { %3342 = vpow2.f32 %v1124_v22  ;;  %v3955_v33 = vpop.permute.xlu1 %966 }
 0x4ed   : > { %1233 = vrot.lane.b32.xlu0 %v985_v24, %s3453_s27  ;;  %1231 = vrot.lane.b32.xlu1 %v984_v26, %s3453_s27  ;;  %v970_v34 = vmul.f32 %v3808_v45, %v3955_v33  ;;  %v969_v36 = vmul.f32 %v3955_v33, %v3812_v47 }
 0x4ee   : > { %v3947_v30 = vpop.permute.xlu0 %971 }
 0x4ef   : > { %v975_v31 = vmul.f32 %v3808_v45, %v3947_v30  ;;  %v974_v32 = vmul.f32 %v3947_v30, %v3812_v47 }
 0x4f1   : > { %1229 = vrot.lane.b32.xlu0 %v980_v28, %s3453_s27  ;;  %1227 = vrot.lane.b32.xlu1 %v979_v29, %s3453_s27  ;;  %v1467_v28 = vld [vmem:[%s4373_s12 + $0x18] sm:$0xff]  ;;  %v1466_v29 = vld [vmem:[%s4373_s12 + $0x10] sm:$0xff] }
 0x4f5   : > { %1225 = vrot.lane.b32.xlu0 %v975_v31, %s3453_s27  ;;  %1223 = vrot.lane.b32.xlu1 %v974_v32, %s3453_s27  ;;  %v1465_v31 = vld [vmem:[%s4373_s12 + $0x8] sm:$0xff]  ;;  %v1464_v32 = vld [vmem:[%s4373_s12] sm:$0xff] }
 0x4f8   : > { %v3341_v35 = vpop.eup %3340 }
 0x4f9   : > { %v3343_v37 = vpop.eup %3342  ;;  %3086 = vmatprep.mubr.msk.f32.mxu1 %vm1113_vm11, %v3341_v35  ;;  %1221 = vrot.lane.b32.xlu0 %v970_v34, %s3453_s27 }
 0x4fa   : > { %1219 = vrot.lane.b32.xlu1 %v969_v36, %s3453_s27  ;;  %3087 = vmatmul.mubr.msk.f32.vlgmr.msra.gmra.mxu1 %vm1113_vm11, %v3343_v37 }
 0x4fb   : > { %3109 = vmatpush3.msra.mxu1 %v1327_v38 }
 0x4fc   : > { %3110 = vmatprep.subr.mxu1 %v1326_v39 }
 0x4fd   : > { %3111 = vmatpush3.msra.mxu1 %v1326_v39 }
 0x4fe   : > { %3112 = vmatprep.subr.mxu1 %v1325_v58 }
 0x4ff   : > { %3113 = vmatpush3.msra.mxu1 %v1325_v58  ;;  %v1621_v58 = vld [vmem:[%s4375_s14 + $0x58] sm:$0xff] }
 0x500   : > { %3114 = vmatprep.subr.mxu1 %v1324_v59 }
 0x501   : > { %3115 = vmatpush3.msra.mxu1 %v1324_v59  ;;  %v1620_v59 = vld [vmem:[%s4375_s14 + $0x50] sm:$0xff] }
 0x55f   : > { %v1232_v40 = vpop.permute.xlu1 %1231  ;;  %v1234_v41 = vpop.permute.xlu0 %1233 }
 0x560   : > { %3089 = vmatprep.subr.mxu0 %v1234_v41 }
 0x561   : > { %3090 = vmatpush3.msra.mxu0 %v1234_v41  ;;  %v2741_v41 = vld [vmem:[%s4371_s10] ss:$0 sm:$0xff] }
 0x562   : > { %3091 = vmatprep.subr.mxu0 %v1232_v40 }
 0x563   : > { %v1228_v42 = vpop.permute.xlu1 %1227  ;;  %3092 = vmatpush3.msra.mxu0 %v1232_v40  ;;  %v1230_v45 = vpop.permute.xlu0 %1229 }
 0x564   : > { %3093 = vmatprep.subr.mxu0 %v1230_v45 }
 0x565   : > { %3094 = vmatpush3.msra.mxu0 %v1230_v45  ;;  %v2742_v45 = vld [vmem:[%s4372_s11] ss:$0 sm:$0xff] }
 0x566   : > { %3095 = vmatprep.subr.mxu0 %v1228_v42 }
 0x567   : > { %v1224_v46 = vpop.permute.xlu1 %1223  ;;  %3096 = vmatpush3.msra.mxu0 %v1228_v42  ;;  %v1226_v47 = vpop.permute.xlu0 %1225 }
 0x568   : > { %3097 = vmatprep.subr.mxu0 %v1226_v47 }
 0x569   : > { %3098 = vmatpush3.msra.mxu0 %v1226_v47 }
 0x56a   : > { %3099 = vmatprep.subr.mxu0 %v1224_v46 }
 0x56b   : > { %3100 = vmatpush3.msra.mxu0 %v1224_v46  ;;  %v1222_v48 = vpop.permute.xlu0 %1221 }
 0x56c   : > { %3101 = vmatprep.subr.mxu0 %v1222_v48  ;;  %v1220_v50 = vpop.permute.xlu1 %1219 }
 0x56d   : > { %3102 = vmatpush3.msra.mxu0 %v1222_v48 }
 0x56e   : > { %3103 = vmatprep.subr.mxu0 %v1220_v50 }
 0x56f   : > { %3104 = vmatpush3.msra.mxu0 %v1220_v50 }
 0x570   : > { %3119 = vmatprep.subr.mxu0 %v1467_v28 }
 0x5ba   : > { %v3088_v51 = vpop.f32.mrf.mxu1 }
 0x5bb   : > { %3344 = vrcp.f32 %v3088_v51 }
 0x5bc   : > { %v1198_v52 = vpop.f32.mrf.mxu1 }
 0x5bd   : > { %3346 = vrcp.f32 %v1198_v52 }
 0x5c8   : > { %v3345_v54 = vpop.eup %3344 }
 0x5c9   : > { %v1210_v57 = vmul.f32 %v3345_v54, %v3343_v37  ;;  %v1625_v54 = vld [vmem:[%s4375_s14 + $0x78] sm:$0xff] }
 0x5ca   : > { %v3347_v55 = vpop.eup %3346  ;;  %3130 = vmatprep.subr.mxu1 %v1625_v54 }
 0x5cb   : > { %v1209_v56 = vmul.f32 %v3347_v55, %v3341_v35  ;;  %v1624_v55 = vld [vmem:[%s4375_s14 + $0x70] sm:$0xff] }
 0x5cd   : > { %3105 = vmatprep.mubr.msk.f32.mxu0 %vm1113_vm11, %v1209_v56  ;;  %v1623_v56 = vld [vmem:[%s4375_s14 + $0x68] sm:$0xff] }
 0x5ce   : > { %3106 = vmatmul.mubr.msk.f32.vlgmr.msra.gmra.mxu0 %vm1113_vm11, %v1210_v57  ;;  %v1622_v57 = vld [vmem:[%s4375_s14 + $0x60] sm:$0xff] }
 0x5cf   : > { %3120 = vmatpush3.msra.mxu0 %v1467_v28 }
 0x5d0   : > { %3121 = vmatprep.subr.mxu0 %v1466_v29 }
 0x5d1   : > { %3122 = vmatpush3.msra.mxu0 %v1466_v29 }
 0x5d2   : > { %3123 = vmatprep.subr.mxu0 %v1465_v31 }
 0x5d3   : > { %3124 = vmatpush3.msra.mxu0 %v1465_v31 }
 0x5d4   : > { %3125 = vmatprep.subr.mxu0 %v1464_v32 }
 0x5d5   : > { %3126 = vmatpush3.msra.mxu0 %v1464_v32 }
 0x68e   : > { %v3107_v60 = vpop.f32.mrf.mxu0 }
 0x690   : > { %v1315_v61 = vpop.f32.mrf.mxu0 }
 0x691   : > { %3116 = vmatprep.mubr.msk.f32.mxu1 %vm813_vm0, %v1315_v61  ;;  %v1618_v61 = vld [vmem:[%s4375_s14 + $0x40] sm:$0xff] }
 0x692   : > { %3117 = vmatmul.mubr.msk.f32.vlgmr.msra.gmra.mxu1 %vm813_vm0, %v3107_v60  ;;  %v1619_v60 = vld [vmem:[%s4375_s14 + $0x48] sm:$0xff] }
 0x693   : > { %3131 = vmatpush3.msra.mxu1 %v1625_v54 }
 0x694   : > { %3132 = vmatprep.subr.mxu1 %v1624_v55 }
 0x695   : > { %3133 = vmatpush3.msra.mxu1 %v1624_v55 }
 0x696   : > { %3134 = vmatprep.subr.mxu1 %v1623_v56 }
 0x697   : > { %3135 = vmatpush3.msra.mxu1 %v1623_v56 }
 0x698   : > { %3136 = vmatprep.subr.mxu1 %v1622_v57 }
 0x699   : > { %3137 = vmatpush3.msra.mxu1 %v1622_v57 }
 0x69a   : > { %3138 = vmatprep.subr.mxu1 %v1621_v58 }
 0x69b   : > { %3139 = vmatpush3.msra.mxu1 %v1621_v58 }
 0x69c   : > { %3140 = vmatprep.subr.mxu1 %v1620_v59 }
 0x69d   : > { %3141 = vmatpush3.msra.mxu1 %v1620_v59 }
 0x69e   : > { %3142 = vmatprep.subr.mxu1 %v1619_v60 }
 0x69f   : > { %3143 = vmatpush3.msra.mxu1 %v1619_v60 }
 0x6a0   : > { %3144 = vmatprep.subr.mxu1 %v1618_v61 }
 0x6a1   : > { %3145 = vmatpush3.msra.mxu1 %v1618_v61 }
 0x752   : > { %v3118_v62 = vpop.f32.mrf.mxu1 }
 0x753   : > { %v1410_v1 = vadd.f32 %v3118_v62, %v3764_v4  ;;  %v1617_v62 = vld [vmem:[%s4375_s14 + $0x38] sm:$0xff] }
 0x754   : > { %v1400_v3 = vpop.f32.mrf.mxu1  ;;  %3146 = vmatprep.subr.mxu1 %v1617_v62 }
 0x755   : > { %v3987_v5 = vadd.f32 %v2740_v63, %v1410_v1  ;;  %v1409_v6 = vadd.f32 %v1400_v3, %v3760_v0  ;;  %3147 = vmatpush3.msra.mxu1 %v1617_v62  ;;  %v1615_v1 = vld [vmem:[%s4375_s14 + $0x28] sm:$0xff]  ;;  %v1614_v3 = vld [vmem:[%s4375_s14 + $0x20] sm:$0xff] }
 0x757   : > { %v3990_v7 = vadd.f32 %v2740_v63, %v1409_v6  ;;  %v1425_v8 = vsel %vm813_vm0, %v3987_v5, 0.0  ;;  %v1616_v63 = vld [vmem:[%s4375_s14 + $0x30] sm:$0xff]  ;;  %v1613_v6 = vld [vmem:[%s4375_s14 + $0x18] sm:$0xff] }
 0x758   : > { %1426 = vadd.xlane.f32.xlu1 %v1425_v8  ;;  %3148 = vmatprep.subr.mxu1 %v1616_v63  ;;  %v1612_v8 = vld [vmem:[%s4375_s14 + $0x10] sm:$0xff] }
 0x759   : > { %v1422_v9 = vsel %vm813_vm0, %v3990_v7, 0.0  ;;  %3149 = vmatpush3.msra.mxu1 %v1616_v63 }
 0x75a   : > { %1423 = vadd.xlane.f32.xlu0 %v1422_v9  ;;  %3150 = vmatprep.subr.mxu1 %v1615_v1  ;;  %v1611_v9 = vld [vmem:[%s4375_s14 + $0x8] sm:$0xff] }
 0x75b   : > { %3151 = vmatpush3.msra.mxu1 %v1615_v1 }
 0x75c   : > { %3152 = vmatprep.subr.mxu1 %v1614_v3 }
 0x75d   : > { %3153 = vmatpush3.msra.mxu1 %v1614_v3 }
 0x75e   : > { %3154 = vmatprep.subr.mxu1 %v1613_v6 }
 0x75f   : > { %3155 = vmatpush3.msra.mxu1 %v1613_v6 }
 0x760   : > { %3156 = vmatprep.subr.mxu1 %v1612_v8 }
 0x761   : > { %3157 = vmatpush3.msra.mxu1 %v1612_v8 }
 0x762   : > { %3158 = vmatprep.subr.mxu1 %v1611_v9 }
 0x763   : > { %3159 = vmatpush3.msra.mxu1 %v1611_v9 }
 0x7e1   : > { %v1427_v18 = vpop.xlane.xlu1 %1426 }
 0x7e2   : > { %v1429_v19 = vmul.f32 0.03125, %v1427_v18  ;;  %v1610_v18 = vld [vmem:[%s4375_s14] sm:$0xff] }
 0x7e3   : > { %v1424_v20 = vpop.xlane.xlu0 %1423  ;;  %3160 = vmatprep.subr.mxu1 %v1610_v18 }
 0x7e4   : > { %v1428_v21 = vmul.f32 0.03125, %v1424_v20  ;;  %v1431_v4 = vsub.f32 %v3987_v5, %v1429_v19  ;;  %3161 = vmatpush3.msra.mxu1 %v1610_v18  ;;  %v2743_v19 = vld [vmem:[%s4374_s13] ss:$0 sm:$0xff] }
 0x7e5   : > { %3195 = vmatprep.subr.mxu1 %v3872_v10 }
 0x7e6   : > { %v1430_v22 = vsub.f32 %v3990_v7, %v1428_v21  ;;  %v1433_v24 = vmul.f32 %v1431_v4, %v1431_v4 }
 0x7e8   : > { %v1432_v23 = vmul.f32 %v1430_v22, %v1430_v22  ;;  %v1437_v26 = vsel %vm813_vm0, %v1433_v24, 0.0 }
 0x7ea   : > { %v1434_v0 = vsel %vm813_vm0, %v1432_v23, 0.0 }
 0x7eb   : > { %1435 = vadd.xlane.f32.xlu0 %v1434_v0 }
 0x7ef   : > { %1438 = vadd.xlane.f32.xlu0 %v1437_v26 }
 0x874   : > { %v1436_v34 = vpop.xlane.xlu0 %1435 }
 0x875   : > { %v1440_v35 = vmul.f32 0.03125, %v1436_v34 }
 0x877   : > { %v1442_v36 = vadd.f32 1e-05, %v1440_v35 }
 0x878   : > { %v1439_v37 = vpop.xlane.xlu0 %1438 }
 0x879   : > { %3348 = vrsqrt.f32 %v1442_v36  ;;  %v1441_v38 = vmul.f32 0.03125, %v1439_v37 }
 0x87b   : > { %v1443_v39 = vadd.f32 1e-05, %v1441_v38 }
 0x87d   : > { %3350 = vrsqrt.f32 %v1443_v39 }
 0x886   : > { %v3349_v40 = vpop.eup %3348 }
 0x887   : > { %v1446_v42 = vmul.f32 %v3349_v40, %v1430_v22 }
 0x889   : > { %v1454_v46 = vmul.f32 %v2741_v41, %v1446_v42 }
 0x88a   : > { %v3351_v47 = vpop.eup %3350 }
 0x88b   : > { %v1447_v48 = vmul.f32 %v3351_v47, %v1431_v4  ;;  %v1462_v50 = vadd.f32 %v2742_v45, %v1454_v46 }
 0x88d   : > { %v1455_v51 = vmul.f32 %v2741_v41, %v1447_v48  ;;  %3127 = vmatprep.mubr.msk.f32.mxu0 %vm813_vm0, %v1462_v50 }
 0x88f   : > { %v1463_v52 = vadd.f32 %v2742_v45, %v1455_v51 }
 0x891   : > { %3128 = vmatmul.mubr.msk.f32.vlgmr.msra.gmra.mxu0 %vm813_vm0, %v1463_v52 }
 0x951   : > { %v3129_v20 = vpop.f32.mrf.mxu0 }
 0x952   : > { %v1553_v21 = vadd.f32 %v3129_v20, %v2743_v19 }
 0x953   : > { %v1547_v4 = vpop.f32.mrf.mxu0 }
 0x954   : > { %v1559_v22 = vmul.f32 0.70710677, %v1553_v21  ;;  %v1548_v23 = vadd.f32 %v2743_v19, %v1547_v4 }
 0x956   : > { %v1561_v0 = vand.u32 2147483647, %v1559_v22  ;;  %v1558_v24 = vmul.f32 0.70710677, %v1548_v23  ;;  %vm1601_vm12 = vcmp.lt.f32.partialorder %v1559_v22, 0.0 }
 0x958   : > { %v1563_v26 = vmul.f32 0.3275911, %v1561_v0  ;;  %v1560_v28 = vand.u32 2147483647, %v1558_v24  ;;  %v1589_v34 = vsub.f32 0.0, %v1561_v0  ;;  %vm1600_vm13 = vcmp.lt.f32.partialorder %v1558_v24, 0.0 }
 0x95a   : > { %v1565_v29 = vadd.f32 1.0, %v1563_v26  ;;  %v1562_v31 = vmul.f32 0.3275911, %v1560_v28  ;;  %v1588_v35 = vsub.f32 0.0, %v1560_v28  ;;  %v1591_v36 = vmul.f32 %v1589_v34, %v1561_v0 }
 0x95c   : > { %3352 = vrcp.f32 %v1565_v29  ;;  %v1564_v32 = vadd.f32 1.0, %v1562_v31  ;;  %v1590_v38 = vmul.f32 %v1588_v35, %v1560_v28  ;;  %v1594_v40 = vmul.f32 1.442695, %v1591_v36 }
 0x95d   : > { %v1556_v28 = vmul.f32 0.5, %v1548_v23  ;;  %v1557_v31 = vmul.f32 0.5, %v1553_v21 }
 0x95e   : > { %3354 = vrcp.f32 %v1564_v32  ;;  %v1592_v45 = vmul.f32 1.442695, %v1590_v38 }
 0x95f   : > { %3356 = vpow2.f32 %v1594_v40  ;;  %v2754_v40 = vld [vmem:[%s4368_s7 + $0x38] sm:$0xff] }
 0x960   : > { %3358 = vpow2.f32 %v1592_v45  ;;  %3165 = vmatprep.subr.mxu0 %v2754_v40  ;;  %v2751_v45 = vld [vmem:[%s4368_s7 + $0x20] sm:$0xff] }
 0x961   : > { %3166 = vmatpush3.msra.mxu0 %v2754_v40 }
 0x969   : > { %v3353_v37 = vpop.eup %3352 }
 0x96a   : > { %v1571_v39 = vmul.f32 1.0614054, %v3353_v37 }
 0x96b   : > { %v3355_v41 = vpop.eup %3354 }
 0x96c   : > { %v1573_v42 = vadd.f32 -1.4531521, %v1571_v39  ;;  %v1570_v46 = vmul.f32 1.0614054, %v3355_v41  ;;  %v3357_v62 = vpop.eup %3356 }
 0x96d   : > { %v3359_v6 = vpop.eup %3358 }
 0x96e   : > { %v1575_v47 = vmul.f32 %v3353_v37, %v1573_v42  ;;  %v1572_v48 = vadd.f32 -1.4531521, %v1570_v46  ;;  %v2752_v42 = vld [vmem:[%s4368_s7 + $0x28] sm:$0xff] }
 0x970   : > { %v1577_v50 = vadd.f32 1.4214138, %v1575_v47  ;;  %v1574_v51 = vmul.f32 %v3355_v41, %v1572_v48 }
 0x972   : > { %v1579_v52 = vmul.f32 %v3353_v37, %v1577_v50  ;;  %v1576_v54 = vadd.f32 1.4214138, %v1574_v51 }
 0x974   : > { %v1581_v55 = vadd.f32 -0.28449672, %v1579_v52  ;;  %v1578_v56 = vmul.f32 %v3355_v41, %v1576_v54 }
 0x976   : > { %v1583_v57 = vmul.f32 %v3353_v37, %v1581_v55  ;;  %v1580_v58 = vadd.f32 -0.28449672, %v1578_v56  ;;  %v2749_v55 = vld [vmem:[%s4366_s5 + $0x1] ss:$0 sm:$0xff] }
 0x978   : > { %v1585_v59 = vadd.f32 0.2548296, %v1583_v57  ;;  %v1582_v60 = vmul.f32 %v3355_v41, %v1580_v58 }
 0x97a   : > { %v1587_v61 = vmul.f32 %v3353_v37, %v1585_v59  ;;  %v1584_v63 = vadd.f32 0.2548296, %v1582_v60  ;;  %v2750_v60 = vld [vmem:[%s4367_s6 + $0x1] ss:$0 sm:$0xff] }
 0x97c   : > { %v1597_v1 = vmul.f32 %v3357_v62, %v1587_v61  ;;  %v1586_v3 = vmul.f32 %v3355_v41, %v1584_v63  ;;  %v2753_v41 = vld [vmem:[%s4368_s7 + $0x30] sm:$0xff] }
 0x97d   : > { %3167 = vmatprep.subr.mxu0 %v2753_v41 }
 0x97e   : > { %v1599_v8 = vsub.f32 1.0, %v1597_v1  ;;  %v1596_v9 = vmul.f32 %v3359_v6, %v1586_v3  ;;  %3168 = vmatpush3.msra.mxu0 %v2753_v41 }
 0x97f   : > { %3169 = vmatprep.subr.mxu0 %v2752_v42 }
 0x980   : > { %v1603_v18 = vsub.f32 0.0, %v1599_v8  ;;  %v1598_v19 = vsub.f32 1.0, %v1596_v9  ;;  %3170 = vmatpush3.msra.mxu0 %v2752_v42 }
 0x981   : > { %3171 = vmatprep.subr.mxu0 %v2751_v45 }
 0x982   : > { %v1605_v20 = vsel %vm1601_vm12, %v1603_v18, %v1599_v8  ;;  %v1602_v4 = vsub.f32 0.0, %v1598_v19  ;;  %3172 = vmatpush3.msra.mxu0 %v2751_v45 }
 0x983   : > { %v1607_v0 = vadd.f32 1.0, %v1605_v20 }
 0x984   : > { %v1604_v26 = vsel %vm1600_vm13, %v1602_v4, %v1598_v19 }
 0x985   : > { %v1606_v29 = vadd.f32 1.0, %v1604_v26  ;;  %v1609_v34 = vmul.f32 %v1607_v0, %v1557_v31 }
 0x987   : > { %v1608_v32 = vmul.f32 %v1606_v29, %v1556_v28 }
 0x989   : > { %3162 = vmatprep.mubr.f32.mxu1 %v1608_v32 }
 0x98a   : > { %3163 = vmatmul.mubr.f32.vlgmr.msra.gmra.mxu1 %v1609_v34 }
 0x98b   : > { %3196 = vmatpush3.msra.mxu1 %v3872_v10 }
 0x98c   : > { %3197 = vmatprep.subr.mxu1 %v3878_v11 }
 0x98d   : > { %3198 = vmatpush3.msra.mxu1 %v3878_v11  ;;  %v2746_v11 = vld [vmem:[%s4376_s15] ss:$0 sm:$0xff] }
 0x98e   : > { %3199 = vmatprep.subr.mxu1 %v3887_v12 }
 0x98f   : > { %3200 = vmatpush3.msra.mxu1 %v3887_v12 }
 0x990   : > { %3201 = vmatprep.subr.mxu1 %v3893_v13 }
 0x991   : > { %3202 = vmatpush3.msra.mxu1 %v3893_v13 }
 0x992   : > { %3203 = vmatprep.subr.mxu1 %v3903_v14 }
 0x993   : > { %3204 = vmatpush3.msra.mxu1 %v3903_v14 }
 0x994   : > { %3205 = vmatprep.subr.mxu1 %v3909_v15 }
 0x995   : > { %3206 = vmatpush3.msra.mxu1 %v3909_v15 }
 0x996   : > { %3207 = vmatprep.subr.mxu1 %v3919_v16 }
 0x997   : > { %3208 = vmatpush3.msra.mxu1 %v3919_v16 }
 0x998   : > { %3209 = vmatprep.subr.mxu1 %v3925_v17 }
 0x999   : > { %3210 = vmatpush3.msra.mxu1 %v3925_v17 }
 0xa4a   : > { %v3164_v10 = vpop.f32.mrf.mxu1 }
 0xa4b   : > { %v1702_v12 = vadd.f32 %v3164_v10, %v3987_v5 }
 0xa4c   : > { %v1692_v13 = vpop.f32.mrf.mxu1 }
 0xa4d   : > { %v4091_v14 = vadd.f32 %v2746_v11, %v1702_v12  ;;  %v1701_v15 = vadd.f32 %v1692_v13, %v3990_v7 }
 0xa4f   : > { %v4094_v21 = vadd.f32 %v2746_v11, %v1701_v15  ;;  %v1719_v16 = vsel %vm813_vm0, %v4091_v14, 0.0 }
 0xa50   : > { %1720 = vadd.xlane.f32.xlu1 %v1719_v16 }
 0xa51   : > { %v1716_v17 = vsel %vm813_vm0, %v4094_v21, 0.0 }
 0xa52   : > { %1717 = vadd.xlane.f32.xlu0 %v1716_v17 }
 0xad9   : > { %v1721_v22 = vpop.xlane.xlu1 %1720 }
 0xada   : > { %v1723_v23 = vmul.f32 0.03125, %v1721_v22 }
 0xadb   : > { %v1718_v24 = vpop.xlane.xlu0 %1717 }
 0xadc   : > { %v1725_v5 = vsub.f32 %v4091_v14, %v1723_v23  ;;  %v1722_v35 = vmul.f32 0.03125, %v1718_v24 }
 0xade   : > { %v1724_v36 = vsub.f32 %v4094_v21, %v1722_v35  ;;  %v1727_v37 = vmul.f32 %v1725_v5, %v1725_v5 }
 0xae0   : > { %v1731_v7 = vsel %vm813_vm0, %v1727_v37, 0.0  ;;  %v1726_v38 = vmul.f32 %v1724_v36, %v1724_v36 }
 0xae1   : > { %1732 = vadd.xlane.f32.xlu1 %v1731_v7 }
 0xae2   : > { %v1728_v39 = vsel %vm813_vm0, %v1726_v38, 0.0 }
 0xae3   : > { %1729 = vadd.xlane.f32.xlu0 %v1728_v39 }
 0xb6a   : > { %v1733_v46 = vpop.xlane.xlu1 %1732 }
 0xb6b   : > { %v1735_v47 = vmul.f32 0.03125, %v1733_v46 }
 0xb6c   : > { %v1730_v48 = vpop.xlane.xlu0 %1729 }
 0xb6d   : > { %v1737_v50 = vadd.f32 1e-05, %v1735_v47  ;;  %v1734_v51 = vmul.f32 0.03125, %v1730_v48  ;;  %v2774_v48 = vld [vmem:[%s4369_s8 + $0x38] sm:$0xff] }
 0xb6e   : > { %3233 = vmatprep.subr.mxu1 %v2774_v48 }
 0xb6f   : > { %3360 = vrsqrt.f32 %v1737_v50  ;;  %v1736_v52 = vadd.f32 1e-05, %v1734_v51  ;;  %v2773_v50 = vld [vmem:[%s4369_s8 + $0x30] sm:$0xff] }
 0xb71   : > { %3362 = vrsqrt.f32 %v1736_v52 }
 0xb7c   : > { %v3361_v54 = vpop.eup %3360 }
 0xb7d   : > { %v1741_v56 = vmul.f32 %v3361_v54, %v1725_v5 }
 0xb7e   : > { %v3363_v57 = vpop.eup %3362 }
 0xb7f   : > { %v1740_v58 = vmul.f32 %v3363_v57, %v1724_v36  ;;  %v1749_v59 = vmul.f32 %v2749_v55, %v1741_v56 }
 0xb81   : > { %v1748_v61 = vmul.f32 %v2749_v55, %v1740_v58  ;;  %v1757_v63 = vadd.f32 %v2750_v60, %v1749_v59  ;;  %v2772_v58 = vld [vmem:[%s4369_s8 + $0x28] sm:$0xff]  ;;  %v2771_v59 = vld [vmem:[%s4369_s8 + $0x20] sm:$0xff] }
 0xb83   : > { %v1756_v62 = vadd.f32 %v2750_v60, %v1748_v61 }
 0xb85   : > { %3173 = vmatprep.mubr.msk.f32.mxu0 %vm813_vm0, %v1756_v62 }
 0xb86   : > { %3174 = vmatmul.mubr.msk.f32.vlgmr.msra.gmra.mxu0 %vm813_vm0, %v1757_v63  ;;  %v2778_v63 = vld [vmem:[%s4370_s9 + $0x1] ss:$0 sm:$0xff] }
 0xc46   : > { %v4124_v1 = vpop.f32.mrf.mxu0 }
 0xc47   : > { %v1851_v3 = vmul.f32 %v4124_v1, %v3806_v44  ;;  %v1847_v9 = vmul.f32 %v4124_v1, %v3819_v49  ;;  %v1849_v18 = vmul.f32 %v4124_v1, %v3804_v43  ;;  %v1845_v19 = vmul.f32 %v4124_v1, %v3830_v53 }
 0xc48   : > { %v1835_v6 = vpop.f32.mrf.mxu0  ;;  %v1859_v17 = vmul.f32 %v4124_v1, %v3933_v25  ;;  %v1855_v24 = vmul.f32 %v4124_v1, %v3947_v30 }
 0xc49   : > { %1882 = vrot.lane.b32.xlu0 %v1851_v3, %s3452_s22  ;;  %3192 = vmatprep.mubr.msk.f32.mxu0 %vm813_vm0, %v1835_v6  ;;  %v1850_v8 = vmul.f32 %v1835_v6, %v3806_v44  ;;  %v1848_v20 = vmul.f32 %v1835_v6, %v3804_v43  ;;  %v1846_v44 = vmul.f32 %v1835_v6, %v3819_v49 }
 0xc4a   : > { %v1844_v4 = vmul.f32 %v1835_v6, %v3830_v53  ;;  %v1858_v15 = vmul.f32 %v1835_v6, %v3933_v25  ;;  %v1856_v16 = vmul.f32 %v1835_v6, %v3939_v27  ;;  %v1854_v22 = vmul.f32 %v1835_v6, %v3947_v30 }
 0xc4b   : > { %1880 = vrot.lane.b32.xlu1 %v1850_v8, %s3452_s22  ;;  %v1852_v23 = vmul.f32 %v1835_v6, %v3955_v33  ;;  %v1853_v25 = vmul.f32 %v4124_v1, %v3955_v33 }
 0xc4d   : > { %1874 = vrot.lane.b32.xlu0 %v1847_v9, %s3452_s22 }
 0xc4f   : > { %1878 = vrot.lane.b32.xlu1 %v1849_v18, %s3452_s22 }
 0xc51   : > { %1870 = vrot.lane.b32.xlu0 %v1845_v19, %s3452_s22 }
 0xc53   : > { %1876 = vrot.lane.b32.xlu1 %v1848_v20, %s3452_s22 }
 0xc57   : > { %1872 = vrot.lane.b32.xlu1 %v1846_v44, %s3452_s22 }
 0xc5b   : > { %1868 = vrot.lane.b32.xlu1 %v1844_v4, %s3452_s22  ;;  %s3454_s22 = smov [#allocation2]  }
 0xcbb   : > { %v1883_v0 = vpop.permute.xlu0 %1882 }
 0xcbc   : > { %3176 = vmatprep.subr.msk.mxu0 %vm813_vm0, %v1883_v0 }
 0xcbd   : > { %3177 = vmatpush3.xpose.msk.msra.mxu0 %vm813_vm0, %v1883_v0  ;;  %v1881_v26 = vpop.permute.xlu1 %1880 }
 0xcbe   : > { %3178 = vmatprep.subr.msk.mxu0 %vm813_vm0, %v1881_v26 }
 0xcbf   : > { %v1875_v53 = vpop.permute.xlu0 %1874 }
 0xcc1   : > { %3179 = vmatpush3.xpose.msk.msra.mxu0 %vm813_vm0, %v1881_v26  ;;  %v1879_v43 = vpop.permute.xlu1 %1878 }
 0xcc2   : > { %3180 = vmatprep.subr.msk.mxu0 %vm813_vm0, %v1879_v43 }
 0xcc3   : > { %v1871_v29 = vpop.permute.xlu0 %1870 }
 0xcc5   : > { %3181 = vmatpush3.xpose.msk.msra.mxu0 %vm813_vm0, %v1879_v43  ;;  %v1877_v49 = vpop.permute.xlu1 %1876 }
 0xcc6   : > { %3182 = vmatprep.subr.msk.mxu0 %vm813_vm0, %v1877_v49 }
 0xcc9   : > { %3183 = vmatpush3.xpose.msk.msra.mxu0 %vm813_vm0, %v1877_v49  ;;  %v1873_v28 = vpop.permute.xlu1 %1872 }
 0xcca   : > { %3184 = vmatprep.subr.msk.mxu0 %vm813_vm0, %v1875_v53 }
 0xccd   : > { %3185 = vmatpush3.xpose.msk.msra.mxu0 %vm813_vm0, %v1875_v53  ;;  %v1869_v31 = vpop.permute.xlu1 %1868 }
 0xcce   : > { %3186 = vmatprep.subr.msk.mxu0 %vm813_vm0, %v1873_v28 }
 0xcd1   : > { %3187 = vmatpush3.xpose.msk.msra.mxu0 %vm813_vm0, %v1873_v28  ;;  %v2786_v28 = vld [vmem:[%s4373_s12 + $0x38] sm:$0xff] }
 0xcd2   : > { %3188 = vmatprep.subr.msk.mxu0 %vm813_vm0, %v1871_v29 }
 0xcd5   : > { %3189 = vmatpush3.xpose.msk.msra.mxu0 %vm813_vm0, %v1871_v29  ;;  %v2785_v29 = vld [vmem:[%s4373_s12 + $0x30] sm:$0xff] }
 0xcd6   : > { %3190 = vmatprep.subr.msk.mxu0 %vm813_vm0, %v1869_v31 }
 0xcd9   : > { %3191 = vmatpush3.xpose.msk.msra.mxu0 %vm813_vm0, %v1869_v31  ;;  %v2784_v31 = vld [vmem:[%s4373_s12 + $0x28] sm:$0xff] }
 0xcdc   : > { %3193 = vmatmul.mubr.msk.f32.vlgmr.msra.gmra.mxu0 %vm813_vm0, %v4124_v1 }
 0xd9c   : > { %v3194_v32 = vpop.f32.mrf.mxu0 }
 0xd9d   : > { %v1978_v34 = vadd.f32 %v3194_v32, %v3863_v2  ;;  %v2783_v32 = vld [vmem:[%s4373_s12 + $0x20] sm:$0xff] }
 0xd9e   : > { %v1972_v10 = vpop.f32.mrf.mxu0 }
 0xd9f   : > { %v1973_v11 = vadd.f32 %v3863_v2, %v1972_v10  ;;  %v1984_v12 = vsel %vm1113_vm11, %v1978_v34, -inf  ;;  %v1857_v2 = vmul.f32 %v4124_v1, %v3939_v27 }
 0xda0   : > { %1985 = vmax.xlane.f32.xlu1 %v1984_v12 }
 0xda1   : > { %v1981_v13 = vsel %vm1113_vm11, %v1973_v11, -inf }
 0xda2   : > { %1982 = vmax.xlane.f32.xlu0 %v1981_v13 }
 0xdb1   : > { %2098 = vrot.lane.b32.xlu1 %v1858_v15, %s3453_s27 }
 0xdb5   : > { %2094 = vrot.lane.b32.xlu1 %v1856_v16, %s3453_s27 }
 0xdb8   : > { %2100 = vrot.lane.b32.xlu0 %v1859_v17, %s3453_s27  ;;  %v2781_v17 = vld [vmem:[%s4371_s10 + $0x1] ss:$0 sm:$0xff] }
 0xdb9   : > { %2090 = vrot.lane.b32.xlu1 %v1854_v22, %s3453_s27 }
 0xdbc   : > { %2096 = vrot.lane.b32.xlu0 %v1857_v2, %s3453_s27  ;;  %v2782_v2 = vld [vmem:[%s4372_s11 + $0x1] ss:$0 sm:$0xff] }
 0xdbd   : > { %2086 = vrot.lane.b32.xlu1 %v1852_v23, %s3453_s27 }
 0xdc0   : > { %2092 = vrot.lane.b32.xlu0 %v1855_v24, %s3453_s27 }
 0xdc4   : > { %2088 = vrot.lane.b32.xlu0 %v1853_v25, %s3453_s27  ;;  %s3392_s27 = sshll.u32 %s3454_s22, 4  ;;  %s3393_s27 = int_to_ptr.vmem [resolvable:$false] %s3392_s27 }
 0xdc5   : > { %s3394_s21 = scalar_lea.vmem %s3393_s27, 512  ;;  %p3395_p0 = scmp.lt.s32.totalorder %s4317_s20, %s3393_s27 }
 0xdc6   : > { %p3396_p1 = scmp.lt.s32.totalorder %s3394_s21, %s3388_s25 }
 0xdc8   : > { %p3397_p2 = por %p3396_p1, %p3395_p0 }
 0xdca   : > { %p3398_p3 = pnand %p3397_p2, %p3391_p13 }
 0xe29   : > { %v1986_v5 = vpop.xlane.xlu1 %1985 }
 0xe2a   : > { %v1988_v35 = vsub.f32 %v1978_v34, %v1986_v5 }
 0xe2b   : > { %v1983_v36 = vpop.xlane.xlu0 %1982 }
 0xe2c   : > { %v1987_v27 = vsub.f32 %v1973_v11, %v1983_v36  ;;  %v1991_v37 = vmul.f32 1.442695, %v1988_v35 }
 0xe2d   : > { %v2099_v7 = vpop.permute.xlu1 %2098 }
 0xe2e   : > { %v1989_v38 = vmul.f32 1.442695, %v1987_v27  ;;  %v2806_v27 = vld [vmem:[%s4375_s14 + $0xf8] sm:$0xff] }
 0xe2f   : > { %v2101_v39 = vpop.permute.xlu0 %2100 }
 0xe30   : > { %3364 = vpow2.f32 %v1989_v38  ;;  %3214 = vmatprep.subr.mxu0 %v2101_v39  ;;  %v2803_v38 = vld [vmem:[%s4375_s14 + $0xe0] sm:$0xff] }
 0xe31   : > { %3366 = vpow2.f32 %v1991_v37  ;;  %v2095_v40 = vpop.permute.xlu1 %2094  ;;  %3215 = vmatpush3.msra.mxu0 %v2101_v39  ;;  %v2805_v37 = vld [vmem:[%s4375_s14 + $0xf0] sm:$0xff]  ;;  %v2802_v39 = vld [vmem:[%s4375_s14 + $0xd8] sm:$0xff] }
 0xe32   : > { %3216 = vmatprep.subr.mxu0 %v2099_v7 }
 0xe33   : > { %3217 = vmatpush3.msra.mxu0 %v2099_v7  ;;  %v2097_v30 = vpop.permute.xlu0 %2096  ;;  %v2804_v7 = vld [vmem:[%s4375_s14 + $0xe8] sm:$0xff] }
 0xe34   : > { %3218 = vmatprep.subr.mxu0 %v2097_v30 }
 0xe35   : > { %3219 = vmatpush3.msra.mxu0 %v2097_v30  ;;  %v2091_v33 = vpop.permute.xlu1 %2090  ;;  %v2800_v30 = vld [vmem:[%s4375_s14 + $0xc8] sm:$0xff] }
 0xe36   : > { %3220 = vmatprep.subr.mxu0 %v2095_v40 }
 0xe37   : > { %3221 = vmatpush3.msra.mxu0 %v2095_v40  ;;  %v2093_v41 = vpop.permute.xlu0 %2092  ;;  %v2801_v40 = vld [vmem:[%s4375_s14 + $0xd0] sm:$0xff] }
 0xe38   : > { %3222 = vmatprep.subr.mxu0 %v2093_v41 }
 0xe39   : > { %3223 = vmatpush3.msra.mxu0 %v2093_v41  ;;  %v2087_v46 = vpop.permute.xlu1 %2086  ;;  %v2798_v41 = vld [vmem:[%s4375_s14 + $0xb8] sm:$0xff] }
 0xe3a   : > { %3224 = vmatprep.subr.mxu0 %v2091_v33 }
 0xe3b   : > { %3225 = vmatpush3.msra.mxu0 %v2091_v33  ;;  %v2089_v42 = vpop.permute.xlu0 %2088  ;;  %v2799_v33 = vld [vmem:[%s4375_s14 + $0xc0] sm:$0xff] }
 0xe3c   : > { %3226 = vmatprep.subr.mxu0 %v2089_v42 }
 0xe3d   : > { %v3365_v45 = vpop.eup %3364  ;;  %3227 = vmatpush3.msra.mxu0 %v2089_v42  ;;  %v2797_v42 = vld [vmem:[%s4375_s14 + $0xb0] sm:$0xff] }
 0xe3e   : > { %v3367_v47 = vpop.eup %3366  ;;  %3211 = vmatprep.mubr.msk.f32.mxu1 %vm1113_vm11, %v3365_v45  ;;  %3228 = vmatprep.subr.mxu0 %v2087_v46 }
 0xe3f   : > { %3212 = vmatmul.mubr.msk.f32.vlgmr.msra.gmra.mxu1 %vm1113_vm11, %v3367_v47  ;;  %3229 = vmatpush3.msra.mxu0 %v2087_v46  ;;  %v2795_v46 = vld [vmem:[%s4375_s14 + $0xa0] sm:$0xff] }
 0xe40   : > { %3234 = vmatpush3.msra.mxu1 %v2774_v48  ;;  %3255 = vmatprep.subr.mxu0 %v2806_v27  ;;  %v2793_v48 = vld [vmem:[%s4375_s14 + $0x90] sm:$0xff] }
 0xe41   : > { %3235 = vmatprep.subr.mxu1 %v2773_v50 }
 0xe42   : > { %3236 = vmatpush3.msra.mxu1 %v2773_v50  ;;  %v2792_v50 = vld [vmem:[%s4375_s14 + $0x88] sm:$0xff] }
 0xe43   : > { %3237 = vmatprep.subr.mxu1 %v2772_v58 }
 0xe44   : > { %3238 = vmatpush3.msra.mxu1 %v2772_v58 }
 0xe45   : > { %3239 = vmatprep.subr.mxu1 %v2771_v59 }
 0xe46   : > { %3240 = vmatpush3.msra.mxu1 %v2771_v59 }
 0xe47   : > { %3244 = vmatprep.subr.mxu1 %v2786_v28 }
 0xeff   : > { %v3213_v51 = vpop.f32.mrf.mxu1 }
 0xf00   : > { %3368 = vrcp.f32 %v3213_v51  ;;  %v2791_v51 = vld [vmem:[%s4375_s14 + $0x80] sm:$0xff] }
 0xf01   : > { %v2065_v52 = vpop.f32.mrf.mxu1 }
 0xf02   : > { %3370 = vrcp.f32 %v2065_v52  ;;  %v2788_v52 = vld [vmem:[%s4374_s13 + $0x1] ss:$0 sm:$0xff] }
 0xf0d   : > { %v3369_v54 = vpop.eup %3368 }
 0xf0e   : > { %v2077_v57 = vmul.f32 %v3369_v54, %v3367_v47  ;;  %v2794_v47 = vld [vmem:[%s4375_s14 + $0x98] sm:$0xff] }
 0xf0f   : > { %v3371_v55 = vpop.eup %3370 }
 0xf10   : > { %v2076_v56 = vmul.f32 %v3371_v55, %v3365_v45  ;;  %v2796_v45 = vld [vmem:[%s4375_s14 + $0xa8] sm:$0xff] }
 0xf12   : > { %3230 = vmatprep.mubr.msk.f32.mxu0 %vm1113_vm11, %v2076_v56 }
 0xf13   : > { %3231 = vmatmul.mubr.msk.f32.vlgmr.msra.gmra.mxu0 %vm1113_vm11, %v2077_v57 }
 0xf14   : > { %3256 = vmatpush3.msra.mxu0 %v2806_v27 }
 0xf15   : > { %3257 = vmatprep.subr.mxu0 %v2805_v37 }
 0xf16   : > { %3258 = vmatpush3.msra.mxu0 %v2805_v37 }
 0xf17   : > { %3259 = vmatprep.subr.mxu0 %v2804_v7 }
 0xf18   : > { %3260 = vmatpush3.msra.mxu0 %v2804_v7 }
 0xf19   : > { %3261 = vmatprep.subr.mxu0 %v2803_v38 }
 0xf1a   : > { %3262 = vmatpush3.msra.mxu0 %v2803_v38 }
 0xf1b   : > { %3263 = vmatprep.subr.mxu0 %v2802_v39 }
 0xf1c   : > { %3264 = vmatpush3.msra.mxu0 %v2802_v39 }
 0xf1d   : > { %3265 = vmatprep.subr.mxu0 %v2801_v40 }
 0xf1e   : > { %3266 = vmatpush3.msra.mxu0 %v2801_v40 }
 0xf1f   : > { %3267 = vmatprep.subr.mxu0 %v2800_v30 }
 0xf20   : > { %3268 = vmatpush3.msra.mxu0 %v2800_v30 }
 0xf21   : > { %3269 = vmatprep.subr.mxu0 %v2799_v33 }
 0xf22   : > { %3270 = vmatpush3.msra.mxu0 %v2799_v33 }
 0xf23   : > { %3271 = vmatprep.subr.mxu0 %v2798_v41 }
 0xf24   : > { %3272 = vmatpush3.msra.mxu0 %v2798_v41 }
 0xf25   : > { %3273 = vmatprep.subr.mxu0 %v2797_v42 }
 0xf26   : > { %3274 = vmatpush3.msra.mxu0 %v2797_v42 }
 0xf27   : > { %3275 = vmatprep.subr.mxu0 %v2796_v45 }
 0xf28   : > { %3276 = vmatpush3.msra.mxu0 %v2796_v45  ;;  %v2808_v45 = vld [vmem:[%s4376_s15 + $0x1] ss:$0 sm:$0xff] }
 0xf29   : > { %3277 = vmatprep.subr.mxu0 %v2795_v46 }
 0xf2a   : > { %3278 = vmatpush3.msra.mxu0 %v2795_v46 }
 0xf2b   : > { %3279 = vmatprep.subr.mxu0 %v2794_v47 }
 0xf2c   : > { %3280 = vmatpush3.msra.mxu0 %v2794_v47 }
 0xf2d   : > { %3281 = vmatprep.subr.mxu0 %v2793_v48 }
 0xf2e   : > { %3282 = vmatpush3.msra.mxu0 %v2793_v48 }
 0xf2f   : > { %3283 = vmatprep.subr.mxu0 %v2792_v50 }
 0xf30   : > { %3284 = vmatpush3.msra.mxu0 %v2792_v50 }
 0xf31   : > { %3285 = vmatprep.subr.mxu0 %v2791_v51 }
 0xf32   : > { %3286 = vmatpush3.msra.mxu0 %v2791_v51 }
 0xfd3   : > { %v3232_v60 = vpop.f32.mrf.mxu0 }
 0xfd5   : > { %v2182_v61 = vpop.f32.mrf.mxu0 }
 0xfd6   : > { %3241 = vmatprep.mubr.msk.f32.mxu1 %vm813_vm0, %v2182_v61 }
 0xfd7   : > { %3242 = vmatmul.mubr.msk.f32.vlgmr.msra.gmra.mxu1 %vm813_vm0, %v3232_v60 }
 0xfd8   : > { %3245 = vmatpush3.msra.mxu1 %v2786_v28 }
 0xfd9   : > { %3246 = vmatprep.subr.mxu1 %v2785_v29 }
 0xfda   : > { %3247 = vmatpush3.msra.mxu1 %v2785_v29 }
 0xfdb   : > { %3248 = vmatprep.subr.mxu1 %v2784_v31 }
 0xfdc   : > { %3249 = vmatpush3.msra.mxu1 %v2784_v31 }
 0xfdd   : > { %3250 = vmatprep.subr.mxu1 %v2783_v32 }
 0xfde   : > { %3251 = vmatpush3.msra.mxu1 %v2783_v32 }
0x1097   : > { %v3243_v62 = vpop.f32.mrf.mxu1 }
0x1098   : > { %v2278_v1 = vadd.f32 %v3243_v62, %v4091_v14 }
0x1099   : > { %v2268_v3 = vpop.f32.mrf.mxu1 }
0x109a   : > { %v4211_v6 = vadd.f32 %v2778_v63, %v2278_v1  ;;  %v2277_v8 = vadd.f32 %v2268_v3, %v4094_v21 }
0x109c   : > { %v4214_v9 = vadd.f32 %v2778_v63, %v2277_v8  ;;  %v2296_v18 = vsel %vm813_vm0, %v4211_v6, 0.0 }
0x109d   : > { %2297 = vadd.xlane.f32.xlu1 %v2296_v18 }
0x109e   : > { %v2293_v19 = vsel %vm813_vm0, %v4214_v9, 0.0 }
0x109f   : > { %2294 = vadd.xlane.f32.xlu0 %v2293_v19 }
0x1126   : > { %v2298_v20 = vpop.xlane.xlu1 %2297 }
0x1127   : > { %v2300_v44 = vmul.f32 0.03125, %v2298_v20 }
0x1128   : > { %v2295_v4 = vpop.xlane.xlu0 %2294 }
0x1129   : > { %v2299_v0 = vmul.f32 0.03125, %v2295_v4  ;;  %v2302_v14 = vsub.f32 %v4211_v6, %v2300_v44 }
0x112b   : > { %v2301_v26 = vsub.f32 %v4214_v9, %v2299_v0  ;;  %v2304_v49 = vmul.f32 %v2302_v14, %v2302_v14 }
0x112d   : > { %v2303_v43 = vmul.f32 %v2301_v26, %v2301_v26  ;;  %v2308_v53 = vsel %vm813_vm0, %v2304_v49, 0.0 }
0x112f   : > { %v2305_v21 = vsel %vm813_vm0, %v2303_v43, 0.0 }
0x1130   : > { %2306 = vadd.xlane.f32.xlu0 %v2305_v21 }
0x1134   : > { %2309 = vadd.xlane.f32.xlu0 %v2308_v53 }
0x11b9   : > { %v2307_v34 = vpop.xlane.xlu0 %2306 }
0x11ba   : > { %v2311_v10 = vmul.f32 0.03125, %v2307_v34 }
0x11bc   : > { %v2313_v11 = vadd.f32 1e-05, %v2311_v10 }
0x11bd   : > { %v2310_v12 = vpop.xlane.xlu0 %2309 }
0x11be   : > { %3372 = vrsqrt.f32 %v2313_v11  ;;  %v2312_v13 = vmul.f32 0.03125, %v2310_v12 }
0x11c0   : > { %v2314_v15 = vadd.f32 1e-05, %v2312_v13 }
0x11c2   : > { %3374 = vrsqrt.f32 %v2314_v15 }
0x11cb   : > { %v3373_v16 = vpop.eup %3372 }
0x11cc   : > { %v2317_v22 = vmul.f32 %v3373_v16, %v2301_v26 }
0x11ce   : > { %v2325_v23 = vmul.f32 %v2781_v17, %v2317_v22 }
0x11cf   : > { %v3375_v24 = vpop.eup %3374 }
0x11d0   : > { %v2318_v25 = vmul.f32 %v3375_v24, %v2302_v14  ;;  %v2333_v5 = vadd.f32 %v2782_v2, %v2325_v23 }
0x11d2   : > { %v2326_v35 = vmul.f32 %v2781_v17, %v2318_v25  ;;  %3252 = vmatprep.mubr.msk.f32.mxu1 %vm813_vm0, %v2333_v5 }
0x11d4   : > { %v2334_v36 = vadd.f32 %v2782_v2, %v2326_v35 }
0x11d6   : > { %3253 = vmatmul.mubr.msk.f32.vlgmr.msra.gmra.mxu1 %vm813_vm0, %v2334_v36 }
0x1296   : > { %v3254_v54 = vpop.f32.mrf.mxu1 }
0x1297   : > { %v2426_v55 = vadd.f32 %v3254_v54, %v2788_v52 }
0x1298   : > { %v2420_v56 = vpop.f32.mrf.mxu1 }
0x1299   : > { %v2432_v57 = vmul.f32 0.70710677, %v2426_v55  ;;  %v2421_v58 = vadd.f32 %v2788_v52, %v2420_v56  ;;  %v2430_v30 = vmul.f32 0.5, %v2426_v55 }
0x129b   : > { %v2434_v59 = vand.u32 2147483647, %v2432_v57  ;;  %v2431_v60 = vmul.f32 0.70710677, %v2421_v58  ;;  %vm2474_vm14 = vcmp.lt.f32.partialorder %v2432_v57, 0.0  ;;  %v2429_v39 = vmul.f32 0.5, %v2421_v58 }
0x129d   : > { %v2436_v61 = vmul.f32 0.3275911, %v2434_v59  ;;  %v2433_v62 = vand.u32 2147483647, %v2431_v60  ;;  %v2462_v8 = vsub.f32 0.0, %v2434_v59  ;;  %vm2473_vm15 = vcmp.lt.f32.partialorder %v2431_v60, 0.0 }
0x129f   : > { %v2438_v63 = vadd.f32 1.0, %v2436_v61  ;;  %v2435_v1 = vmul.f32 0.3275911, %v2433_v62  ;;  %v2461_v18 = vsub.f32 0.0, %v2433_v62  ;;  %v2464_v19 = vmul.f32 %v2462_v8, %v2434_v59 }
0x12a1   : > { %3376 = vrcp.f32 %v2438_v63  ;;  %v2437_v3 = vadd.f32 1.0, %v2435_v1  ;;  %v2463_v44 = vmul.f32 %v2461_v18, %v2433_v62  ;;  %v2467_v0 = vmul.f32 1.442695, %v2464_v19 }
0x12a3   : > { %3378 = vrcp.f32 %v2437_v3  ;;  %v2465_v43 = vmul.f32 1.442695, %v2463_v44  ;;  %v2809_v44 = vld [vmem:[%s4377_s16] ss:$0 sm:$0xff] }
0x12a4   : > { %3380 = vpow2.f32 %v2467_v0 }
0x12a5   : > { %3382 = vpow2.f32 %v2465_v43 }
0x12ae   : > { %v3377_v20 = vpop.eup %3376 }
0x12af   : > { %v2444_v4 = vmul.f32 1.0614054, %v3377_v20 }
0x12b0   : > { %v3379_v14 = vpop.eup %3378 }
0x12b1   : > { %v2446_v26 = vadd.f32 -1.4531521, %v2444_v4  ;;  %v2443_v21 = vmul.f32 1.0614054, %v3379_v14  ;;  %v3381_v17 = vpop.eup %3380 }
0x12b2   : > { %v3383_v24 = vpop.eup %3382 }
0x12b3   : > { %v2448_v49 = vmul.f32 %v3377_v20, %v2446_v26  ;;  %v2445_v53 = vadd.f32 -1.4531521, %v2443_v21 }
0x12b5   : > { %v2450_v28 = vadd.f32 1.4214138, %v2448_v49  ;;  %v2447_v29 = vmul.f32 %v3379_v14, %v2445_v53 }
0x12b7   : > { %v2452_v31 = vmul.f32 %v3377_v20, %v2450_v28  ;;  %v2449_v32 = vadd.f32 1.4214138, %v2447_v29 }
0x12b9   : > { %v2454_v34 = vadd.f32 -0.28449672, %v2452_v31  ;;  %v2451_v10 = vmul.f32 %v3379_v14, %v2449_v32 }
0x12bb   : > { %v2456_v11 = vmul.f32 %v3377_v20, %v2454_v34  ;;  %v2453_v12 = vadd.f32 -0.28449672, %v2451_v10 }
0x12bd   : > { %v2458_v13 = vadd.f32 0.2548296, %v2456_v11  ;;  %v2455_v15 = vmul.f32 %v3379_v14, %v2453_v12 }
0x12bf   : > { %v2460_v16 = vmul.f32 %v3377_v20, %v2458_v13  ;;  %v2457_v22 = vadd.f32 0.2548296, %v2455_v15 }
0x12c1   : > { %v2470_v2 = vmul.f32 %v3381_v17, %v2460_v16  ;;  %v2459_v23 = vmul.f32 %v3379_v14, %v2457_v22  ;;  %v2810_v14 = vld [vmem:[%s4378_s17] ss:$0 sm:$0xff] }
0x12c3   : > { %v2472_v25 = vsub.f32 1.0, %v2470_v2  ;;  %v2469_v5 = vmul.f32 %v3383_v24, %v2459_v23 }
0x12c5   : > { %v2476_v35 = vsub.f32 0.0, %v2472_v25  ;;  %v2471_v36 = vsub.f32 1.0, %v2469_v5 }
0x12c7   : > { %v2478_v27 = vsel %vm2474_vm14, %v2476_v35, %v2472_v25  ;;  %v2475_v37 = vsub.f32 0.0, %v2471_v36 }
0x12c8   : > { %v2480_v7 = vadd.f32 1.0, %v2478_v27 }
0x12c9   : > { %v2477_v38 = vsel %vm2473_vm15, %v2475_v37, %v2471_v36 }
0x12ca   : > { %v2479_v40 = vadd.f32 1.0, %v2477_v38  ;;  %v2482_v41 = vmul.f32 %v2480_v7, %v2430_v30 }
0x12cc   : > { %v2481_v33 = vmul.f32 %v2479_v40, %v2429_v39 }
0x12ce   : > { %3287 = vmatprep.mubr.f32.mxu0 %v2481_v33 }
0x12cf   : > { %3288 = vmatmul.mubr.f32.vlgmr.msra.gmra.mxu0 %v2482_v41 }
0x138f   : > { %v3289_v42 = vpop.f32.mrf.mxu0 }
0x1390   : > { %v2576_v46 = vadd.f32 %v3289_v42, %v4211_v6 }
0x1391   : > { %v2566_v47 = vpop.f32.mrf.mxu0 }
0x1392   : > { %v2575_v48 = vadd.f32 %v2566_v47, %v4214_v9  ;;  %v2586_v50 = vadd.f32 %v2808_v45, %v2576_v46 }
0x1394   : > { %v2592_v51 = vsel %vm813_vm0, %v2586_v50, 0.0  ;;  %v2585_v52 = vadd.f32 %v2808_v45, %v2575_v48 }
0x1395   : > { %2593 = vadd.xlane.f32.xlu1 %v2592_v51 }
0x1396   : > { %v2589_v54 = vsel %vm813_vm0, %v2585_v52, 0.0 }
0x1397   : > { %2590 = vadd.xlane.f32.xlu0 %v2589_v54 }
0x141e   : > { %v2594_v55 = vpop.xlane.xlu1 %2593 }
0x141f   : > { %v2596_v56 = vmul.f32 0.03125, %v2594_v55 }
0x1420   : > { %v2591_v57 = vpop.xlane.xlu0 %2590 }
0x1421   : > { %v2598_v58 = vsub.f32 %v2586_v50, %v2596_v56  ;;  %v2595_v59 = vmul.f32 0.03125, %v2591_v57 }
0x1423   : > { %v2597_v60 = vsub.f32 %v2585_v52, %v2595_v59  ;;  %v2600_v61 = vmul.f32 %v2598_v58, %v2598_v58 }
0x1425   : > { %v2604_v6 = vsel %vm813_vm0, %v2600_v61, 0.0  ;;  %v2599_v62 = vmul.f32 %v2597_v60, %v2597_v60 }
0x1426   : > { %2605 = vadd.xlane.f32.xlu1 %v2604_v6 }
0x1427   : > { %v2601_v9 = vsel %vm813_vm0, %v2599_v62, 0.0 }
0x1428   : > { %2602 = vadd.xlane.f32.xlu0 %v2601_v9 }
0x14af   : > { %v2606_v63 = vpop.xlane.xlu1 %2605 }
0x14b0   : > { %v2608_v1 = vmul.f32 0.03125, %v2606_v63 }
0x14b1   : > { %v2603_v3 = vpop.xlane.xlu0 %2602 }
0x14b2   : > { %v2610_v8 = vadd.f32 1e-05, %v2608_v1  ;;  %v2607_v18 = vmul.f32 0.03125, %v2603_v3 }
0x14b4   : > { %3384 = vrsqrt.f32 %v2610_v8  ;;  %v2609_v19 = vadd.f32 1e-05, %v2607_v18 }
0x14b6   : > { %3386 = vrsqrt.f32 %v2609_v19 }
0x14c1   : > { %v3385_v20 = vpop.eup %3384 }
0x14c2   : > { %v2614_v4 = vmul.f32 %v3385_v20, %v2598_v58 }
0x14c3   : > { %v3387_v0 = vpop.eup %3386 }
0x14c4   : > { %v2622_v26 = vmul.f32 %v2809_v44, %v2614_v4  ;;  %v2613_v43 = vmul.f32 %v3387_v0, %v2597_v60 }
0x14c6   : > { %v2621_v21 = vmul.f32 %v2809_v44, %v2613_v43  ;;  %v2630_v49 = vadd.f32 %v2810_v14, %v2622_v26 }
0x14c8   : > { %v2629_v53 = vadd.f32 %v2810_v14, %v2621_v21  ;;  %2632 = vst.msk [vmem:[%s568_s2 + $0x8] sm:$0xff] %vm813_vm0, %v2630_v49 }
0x14ca   : > { %2631 = vst.msk [vmem:[%s568_s2] sm:$0xff] %vm813_vm0, %v2629_v53 }
0x14cb   : > { %3401 = shalt.err (!%p3398_p3)
}
0x14cc   : > { %s3402_s30 = scalar_lea.hbm %s4315_s4, 256  ;;  %s3406_s2 = scalar_lea.hbm %s4413_s3, 512 }
0x14cd   : > { %p3403_p4 = scmp.ne.s32.totalorder %s4315_s4, %s3402_s30  ;;  %p3407_p9 = scmp.lt.s32.totalorder %s4315_s4, %s4413_s3 }
0x14ce   : > { %p3408_p10 = scmp.lt.s32.totalorder %s3406_s2, %s3402_s30 }
0x14cf   : > { %p3404_p7 = pnand %p3403_p4, %p3590_p5 }
0x14d0   : > { %p3409_p11 = por %p3408_p10, %p3407_p9 }
0x14d1   : > { %p3405_p8 = pneg %p3404_p7 }
0x14d3   : > { %p3410_p12 = pnand %p3409_p11, %p3405_p8 }
0x14d5   : > { %3413 = shalt.err (!%p3410_p12)
}
0x14d6   : > { %s3455_s25 = smov 128   ;;  %s3456_s22 = smov 8  }
0x14d7   : > { %3291 = dma.vmem_to_hbm [thread:$0]  (%p3590_p5), %s4317_s20, 256, %s4315_s4, %s4321_s0, %s3455_s25, %s3455_s25, %s3456_s22  }
0x14d8 PF: > { %s4414_s27 = sld [smem:[#allocation7_spill]] }
0x14d9   : > { %s4415_s21 = sld [smem:[#allocation5_spill]] }
0x14de   : > { %p3297_p13 = scmp.ge.s32.totalorder %s4414_s27, 2 }
0x14df   : > { %s2662_s18 = sand.u32 1, %s4415_s21  }
0x14e0   : > { %p3294_p0 = pnand %p3297_p13, %p3594_p6  ;;  %s2663_s30 = scalar_lea.sflag [#allocation3], %s2662_s18 }
0x14e2   : > { %p3295_p1 = pneg %p3294_p0 }
0x14e4   : > { %3431 = dma.done.wait (%p3295_p1), %s2663_s30, 256  }
0x14e5   : > { %3433 = vsyncadd (%p3295_p1), %s2663_s30, 4294967040  ;;  %s4417_s30 = sld [smem:[#allocation8_spill]]  ;;  %s4420_s27 = smov %s3440_s28 }
0x14e6   : > { %s4418_s2 = sld [smem:[#allocation6_spill]] }
0x14e7   : > { %s4419_s29 = sld [smem:[#allocation9_spill]] }
0x14eb   : > { %p28_p2 = scmp.ge.s32.totalorder %s4417_s30, 4  }
0x14ec   : > { %s4421_s28 = smov %s4418_s2 }
0x14ed   :  { %30 = sbr.rel (!%p28_p2) target bundleno = 10 (0xa), region = 138 }
0x14f2   :  { %2668 = vsyncpa [#allocation3], 1 }
0x14f3   :  { %2670 = vsyncpa [#allocation3 + $0x1], 1 }

</bundles_post_ra>
